<compile_context>
chip_gen: v7x
topology: tpu7x:2x2x1
jax: 0.10.0
libtpu: 0.0.40
codegen_flags: <defaults>
</compile_context>

<pallas_src>
import functools

import jax
import jax.numpy as jnp
from jax import lax
from jax.experimental import pallas as pl
from jax.experimental.pallas import tpu as pltpu

SIZE_EMBEDDING = 20
LANE = 128      # lane-dense feature padding
SUBLANE = 8


def _round_up(x, m):
    return ((x + m - 1) // m) * m


def _pad2d(x, rows, cols):
    out = jnp.zeros((rows, cols), x.dtype)
    return out.at[:x.shape[0], :x.shape[1]].set(x)


# ----------------------------- Pallas kernel --------------------------------

def _sage_layer_kernel(src_ref, dst_ref,                         # SMEM (E,) int32
                       h_ref, e_ref, invdeg_ref,                 # VMEM inputs
                       wmn_ref, wme_ref, bm_ref,
                       was_ref, wan_ref, ba_ref,
                       out_ref,                                  # VMEM output
                       h_proj, m_edge, acc,                      # VMEM scratch
                       *, num_edges):
    # (1) Node-side message projection over N rows.  W_msg is applied *before*
    #     the gather/mean (exact re-association: aggregation is linear), so the
    #     matmul runs over N rows instead of E rows.
    h_proj[...] = jnp.dot(h_ref[...], wmn_ref[...],
                          preferred_element_type=jnp.float32)

    # (2) Edge-side message projection + bias over E rows.
    m_edge[...] = (jnp.dot(e_ref[...], wme_ref[...],
                           preferred_element_type=jnp.float32) + bm_ref[...])

    # (3) Segment sum: for each edge, gather h_proj[src] in-kernel (VMEM row
    #     with a dynamic SMEM index) and scatter-add the message into acc[dst].
    acc[...] = jnp.zeros_like(acc)

    def edge_body(e, carry):
        s = src_ref[e]
        d = dst_ref[e]
        row = h_proj[pl.ds(s, 1), :] + m_edge[pl.ds(e, 1), :]
        acc[pl.ds(d, 1), :] = acc[pl.ds(d, 1), :] + row
        return carry

    lax.fori_loop(0, num_edges, edge_body, 0, unroll=True)

    # (4) Mean via precomputed inverse in-degree (0 for isolated nodes, like
    #     DGL fn.mean), then the apply linear (split weights, no concat) + ReLU.
    h_neigh = acc[...] * invdeg_ref[...]
    y = (jnp.dot(h_ref[...], was_ref[...], preferred_element_type=jnp.float32)
         + jnp.dot(h_neigh, wan_ref[...], preferred_element_type=jnp.float32)
         + ba_ref[...])
    out_ref[...] = jnp.maximum(y, 0.0)


_VMEM = pl.BlockSpec(memory_space=pltpu.MemorySpace.VMEM)
_SMEM = pl.BlockSpec(memory_space=pltpu.MemorySpace.SMEM)


def sage_layer(src, dst, h, ef, inv_deg, lp, num_edges):
    n_pad = h.shape[0]
    e_pad = ef.shape[0]
    kernel = functools.partial(_sage_layer_kernel, num_edges=num_edges)

    # Advisory cost hint for the XLA scheduler.
    flops = 2 * (3 * n_pad + e_pad) * LANE * LANE + 2 * num_edges * LANE
    bytes_accessed = 4 * ((n_pad + e_pad + n_pad) * LANE + n_pad
                          + 4 * LANE * LANE + 2 * LANE) + 8 * num_edges

    return pl.pallas_call(
        kernel,
        out_shape=jax.ShapeDtypeStruct((n_pad, LANE), jnp.float32),
        in_specs=[_SMEM, _SMEM] + [_VMEM] * 9,
        out_specs=_VMEM,
        scratch_shapes=[pltpu.VMEM((n_pad, LANE), jnp.float32),   # h_proj
                        pltpu.VMEM((e_pad, LANE), jnp.float32),   # m_edge
                        pltpu.VMEM((n_pad, LANE), jnp.float32)],  # acc
        compiler_params=pltpu.CompilerParams(
            vmem_limit_bytes=32 * 1024 * 1024),
        cost_estimate=pl.CostEstimate(flops=flops, transcendentals=0,
                                      bytes_accessed=bytes_accessed),
    )(src, dst, h, ef, inv_deg,
      lp["w_msg_node"], lp["w_msg_edge"], lp["b_msg"],
      lp["w_apply_self"], lp["w_apply_neigh"], lp["b_apply"])


# ----------------------------- model glue ------------------------------------

def init_linear_params(key, fan_in, fan_out):
    # torch.nn.Linear default init: U(-k, k), k = 1/sqrt(fan_in).
    k = 1.0 / jnp.sqrt(jnp.float32(fan_in))
    kw, kb = jax.random.split(key)
    w = jax.random.uniform(kw, (fan_in, fan_out), jnp.float32, -k, k)
    b = jax.random.uniform(kb, (1, fan_out), jnp.float32, -k, k)
    return w, b


def init_sage_params(key, ndim_in, edim, ndim_out):
    dims = [(ndim_in, SIZE_EMBEDDING),
            (SIZE_EMBEDDING, SIZE_EMBEDDING),
            (SIZE_EMBEDDING, ndim_out)]
    params = []
    for din, dout in dims:
        key, k_msg, k_apply = jax.random.split(key, 3)
        w_msg, b_msg = init_linear_params(k_msg, din + edim, dout)
        w_apply, b_apply = init_linear_params(k_apply, din + dout, dout)
        # Split the concatenated weights and zero-pad to lane-dense 128x128
        # blocks (padding is exact: padded input columns are zero).
        params.append(dict(
            w_msg_node=_pad2d(w_msg[:din], LANE, LANE),
            w_msg_edge=_pad2d(w_msg[din:], LANE, LANE),
            b_msg=_pad2d(b_msg, 1, LANE),
            w_apply_self=_pad2d(w_apply[:din], LANE, LANE),
            w_apply_neigh=_pad2d(w_apply[din:], LANE, LANE),
            b_apply=_pad2d(b_apply, 1, LANE),
        ))
    return params


def sage_forward(params, src, dst, num_nodes, ndim_out, nfeats, efeats):
    # nfeats: (N, 1, ndim_in), efeats: (E, 1, edim); squeeze the singleton axis.
    n2d = nfeats[:, 0, :].astype(jnp.float32)
    e2d = efeats[:, 0, :].astype(jnp.float32)
    num_edges = src.shape[0]

    n_pad = _round_up(num_nodes, SUBLANE)
    e_pad = _round_up(num_edges, SUBLANE)

    h = _pad2d(n2d, n_pad, LANE)
    ef = _pad2d(e2d, e_pad, LANE)

    # Inverse in-degree (mean normalizer); zero for nodes with no in-edges,
    # matching DGL's mean reducer.
    deg = jnp.zeros((num_nodes,), jnp.float32).at[dst].add(1.0)
    inv_deg = jnp.where(deg > 0.0, 1.0 / deg, 0.0)
    inv_deg = _pad2d(inv_deg[:, None], n_pad, 1)

    src_i = src.astype(jnp.int32)
    dst_i = dst.astype(jnp.int32)

    for i, lp in enumerate(params):
        if i != 0:
            # TODO(synk): nn.Dropout is identity in eval mode; training-mode
            # stochastic dropout (pltpu.prng_*) is not implemented.
            pass
        h = sage_layer(src_i, dst_i, h, ef, inv_deg, lp, num_edges)

    # nfeats.sum(1) on the size-1 middle axis is the squeeze already carried;
    # slice away the lane/sublane padding.
    return h[:num_nodes, :ndim_out]


# ------------------------------- main -----------------------------------------

if __name__ == "__main__":
    key = jax.random.PRNGKey(0)

    num_nodes = 8
    num_edges = 16
    ndim_in = 16
    edim = 8
    ndim_out = 8

    k_param, k_src, k_dst, k_nf, k_ef = jax.random.split(key, 5)

    params = init_sage_params(k_param, ndim_in, edim, ndim_out)

    src = jax.random.randint(k_src, (num_edges,), 0, num_nodes)
    dst = jax.random.randint(k_dst, (num_edges,), 0, num_nodes)

    nfeats = jax.random.normal(k_nf, (num_nodes, 1, ndim_in), jnp.float32)
    efeats = jax.random.normal(k_ef, (num_edges, 1, edim), jnp.float32)

    fwd = jax.jit(sage_forward, static_argnums=(3, 4))
    out = fwd(params, src, dst, num_nodes, ndim_out, nfeats, efeats)
    out = jax.block_until_ready(out)

    assert out.shape == (num_nodes, ndim_out), out.shape
    assert jnp.all(jnp.isfinite(out))
    print("KERNEL_OK")
</pallas_src>

<mosaic_0001>
module attributes {stable_mosaic.version = 11 : i64} {
  func.func private @main(%arg0: i32) attributes {dimension_semantics = [#tpu.dimension_semantics<core_parallel>], iteration_bounds = array<i64: 2>, tpu.core_type = #tpu.core_type<sc_scalar_subcore>, window_params = []} {
    return
  }
}

module attributes {stable_mosaic.version = 11 : i64} {
  func.func private @main(%arg0: i32) attributes {dimension_semantics = [#tpu.dimension_semantics<core_parallel>], iteration_bounds = array<i64: 2>, tpu.core_type = #tpu.core_type<sc_scalar_subcore>, window_params = []} {
    return
  }
}

module attributes {stable_mosaic.version = 11 : i64} {
  func.func @_sage_layer_kernel(%arg0: memref<16xi32, #tpu.memory_space<smem>>, %arg1: memref<16xi32, #tpu.memory_space<smem>>, %arg2: memref<8x128xf32, #tpu.memory_space<vmem>>, %arg3: memref<16x128xf32, #tpu.memory_space<vmem>>, %arg4: memref<8x1xf32, #tpu.memory_space<vmem>>, %arg5: memref<128x128xf32, #tpu.memory_space<vmem>>, %arg6: memref<128x128xf32, #tpu.memory_space<vmem>>, %arg7: memref<1x128xf32, #tpu.memory_space<vmem>>, %arg8: memref<128x128xf32, #tpu.memory_space<vmem>>, %arg9: memref<128x128xf32, #tpu.memory_space<vmem>>, %arg10: memref<1x128xf32, #tpu.memory_space<vmem>>, %arg11: memref<8x128xf32, #tpu.memory_space<vmem>>, %arg12: memref<8x128xf32, #tpu.memory_space<vmem>>, %arg13: memref<16x128xf32, #tpu.memory_space<vmem>>, %arg14: memref<8x128xf32, #tpu.memory_space<vmem>>) attributes {dimension_semantics = [], scalar_prefetch = 0 : i64, scratch_operands = 3 : i64, tpu.core_type = #tpu.core_type<tc>} {
    %c0 = arith.constant 0 : index
    %c0_0 = arith.constant 0 : index
    %0 = vector.load %arg2[%c0, %c0_0] : memref<8x128xf32, #tpu.memory_space<vmem>>, vector<8x128xf32>
    %c0_1 = arith.constant 0 : index
    %c0_2 = arith.constant 0 : index
    %1 = vector.load %arg5[%c0_1, %c0_2] : memref<128x128xf32, #tpu.memory_space<vmem>>, vector<128x128xf32>
    %cst = arith.constant dense<0.000000e+00> : vector<8x128xf32>
    %2 = tpu.matmul %0, %1, %cst {dimension_numbers = #tpu.dot_dimension_numbers<[1], [0], [0], [1], [0, 0, 1, 1], [], []>} : vector<8x128xf32>, vector<128x128xf32>, vector<8x128xf32> -> vector<8x128xf32>
    %c0_3 = arith.constant 0 : index
    %c0_4 = arith.constant 0 : index
    %3 = vector.load %arg12[%c0_3, %c0_4] : memref<8x128xf32, #tpu.memory_space<vmem>>, vector<8x128xf32>
    tpu.vector_store %arg12[%c0_3, %c0_4], %2 {strides = array<i32>} : memref<8x128xf32, #tpu.memory_space<vmem>>, vector<8x128xf32>,
    %c0_5 = arith.constant 0 : index
    %c0_6 = arith.constant 0 : index
    %4 = vector.load %arg3[%c0_5, %c0_6] : memref<16x128xf32, #tpu.memory_space<vmem>>, vector<16x128xf32>
    %c0_7 = arith.constant 0 : index
    %c0_8 = arith.constant 0 : index
    %5 = vector.load %arg6[%c0_7, %c0_8] : memref<128x128xf32, #tpu.memory_space<vmem>>, vector<128x128xf32>
    %cst_9 = arith.constant dense<0.000000e+00> : vector<16x128xf32>
    %6 = tpu.matmul %4, %5, %cst_9 {dimension_numbers = #tpu.dot_dimension_numbers<[1], [0], [0], [1], [0, 0, 1, 1], [], []>} : vector<16x128xf32>, vector<128x128xf32>, vector<16x128xf32> -> vector<16x128xf32>
    %c0_10 = arith.constant 0 : index
    %c0_11 = arith.constant 0 : index
    %7 = vector.load %arg7[%c0_10, %c0_11] : memref<1x128xf32, #tpu.memory_space<vmem>>, vector<1x128xf32>
    %8 = vector.broadcast %7 : vector<1x128xf32> to vector<16x128xf32>
    %9 = arith.addf %6, %8 : vector<16x128xf32>
    %c0_12 = arith.constant 0 : index
    %c0_13 = arith.constant 0 : index
    %10 = vector.load %arg13[%c0_12, %c0_13] : memref<16x128xf32, #tpu.memory_space<vmem>>, vector<16x128xf32>
    tpu.vector_store %arg13[%c0_12, %c0_13], %9 {strides = array<i32>} : memref<16x128xf32, #tpu.memory_space<vmem>>, vector<16x128xf32>,
    %cst_14 = arith.constant 0.000000e+00 : f32
    %11 = vector.broadcast %cst_14 : f32 to vector<8x128xf32>
    %c0_15 = arith.constant 0 : index
    %c0_16 = arith.constant 0 : index
    %12 = vector.load %arg14[%c0_15, %c0_16] : memref<8x128xf32, #tpu.memory_space<vmem>>, vector<8x128xf32>
    tpu.vector_store %arg14[%c0_15, %c0_16], %11 {strides = array<i32>} : memref<8x128xf32, #tpu.memory_space<vmem>>, vector<8x128xf32>,
    %c0_i32 = arith.constant 0 : i32
    %13 = arith.index_cast %c0_i32 : i32 to index
    %14 = memref.load %arg0[%13] : memref<16xi32, #tpu.memory_space<smem>>
    %15 = arith.index_cast %c0_i32 : i32 to index
    %16 = memref.load %arg1[%15] : memref<16xi32, #tpu.memory_space<smem>>
    %17 = arith.index_cast %14 : i32 to index
    %c0_17 = arith.constant 0 : index
    %18 = vector.load %arg12[%17, %c0_17] : memref<8x128xf32, #tpu.memory_space<vmem>>, vector<1x128xf32>
    %19 = arith.index_cast %c0_i32 : i32 to index
    %c0_18 = arith.constant 0 : index
    %20 = vector.load %arg13[%19, %c0_18] : memref<16x128xf32, #tpu.memory_space<vmem>>, vector<1x128xf32>
    %21 = arith.addf %18, %20 : vector<1x128xf32>
    %22 = arith.index_cast %16 : i32 to index
    %c0_19 = arith.constant 0 : index
    %23 = vector.load %arg14[%22, %c0_19] : memref<8x128xf32, #tpu.memory_space<vmem>>, vector<1x128xf32>
    %24 = arith.addf %23, %21 : vector<1x128xf32>
    %25 = arith.index_cast %16 : i32 to index
    %c0_20 = arith.constant 0 : index
    %26 = vector.load %arg14[%25, %c0_20] : memref<8x128xf32, #tpu.memory_space<vmem>>, vector<1x128xf32>
    tpu.vector_store %arg14[%25, %c0_20], %24 {strides = array<i32>} : memref<8x128xf32, #tpu.memory_space<vmem>>, vector<1x128xf32>,
    %c1_i32 = arith.constant 1 : i32
    %27 = arith.index_cast %c1_i32 : i32 to index
    %28 = memref.load %arg0[%27] : memref<16xi32, #tpu.memory_space<smem>>
    %29 = arith.index_cast %c1_i32 : i32 to index
    %30 = memref.load %arg1[%29] : memref<16xi32, #tpu.memory_space<smem>>
    %31 = arith.index_cast %28 : i32 to index
    %c0_21 = arith.constant 0 : index
    %32 = vector.load %arg12[%31, %c0_21] : memref<8x128xf32, #tpu.memory_space<vmem>>, vector<1x128xf32>
    %33 = arith.index_cast %c1_i32 : i32 to index
    %c0_22 = arith.constant 0 : index
    %34 = vector.load %arg13[%33, %c0_22] : memref<16x128xf32, #tpu.memory_space<vmem>>, vector<1x128xf32>
    %35 = arith.addf %32, %34 : vector<1x128xf32>
    %36 = arith.index_cast %30 : i32 to index
    %c0_23 = arith.constant 0 : index
    %37 = vector.load %arg14[%36, %c0_23] : memref<8x128xf32, #tpu.memory_space<vmem>>, vector<1x128xf32>
    %38 = arith.addf %37, %35 : vector<1x128xf32>
    %39 = arith.index_cast %30 : i32 to index
    %c0_24 = arith.constant 0 : index
    %40 = vector.load %arg14[%39, %c0_24] : memref<8x128xf32, #tpu.memory_space<vmem>>, vector<1x128xf32>
    tpu.vector_store %arg14[%39, %c0_24], %38 {strides = array<i32>} : memref<8x128xf32, #tpu.memory_space<vmem>>, vector<1x128xf32>,
    %c2_i32 = arith.constant 2 : i32
    %41 = arith.index_cast %c2_i32 : i32 to index
    %42 = memref.load %arg0[%41] : memref<16xi32, #tpu.memory_space<smem>>
    %43 = arith.index_cast %c2_i32 : i32 to index
    %44 = memref.load %arg1[%43] : memref<16xi32, #tpu.memory_space<smem>>
    %45 = arith.index_cast %42 : i32 to index
    %c0_25 = arith.constant 0 : index
    %46 = vector.load %arg12[%45, %c0_25] : memref<8x128xf32, #tpu.memory_space<vmem>>, vector<1x128xf32>
    %47 = arith.index_cast %c2_i32 : i32 to index
    %c0_26 = arith.constant 0 : index
    %48 = vector.load %arg13[%47, %c0_26] : memref<16x128xf32, #tpu.memory_space<vmem>>, vector<1x128xf32>
    %49 = arith.addf %46, %48 : vector<1x128xf32>
    %50 = arith.index_cast %44 : i32 to index
    %c0_27 = arith.constant 0 : index
    %51 = vector.load %arg14[%50, %c0_27] : memref<8x128xf32, #tpu.memory_space<vmem>>, vector<1x128xf32>
    %52 = arith.addf %51, %49 : vector<1x128xf32>
    %53 = arith.index_cast %44 : i32 to index
    %c0_28 = arith.constant 0 : index
    %54 = vector.load %arg14[%53, %c0_28] : memref<8x128xf32, #tpu.memory_space<vmem>>, vector<1x128xf32>
    tpu.vector_store %arg14[%53, %c0_28], %52 {strides = array<i32>} : memref<8x128xf32, #tpu.memory_space<vmem>>, vector<1x128xf32>,
    %c3_i32 = arith.constant 3 : i32
    %55 = arith.index_cast %c3_i32 : i32 to index
    %56 = memref.load %arg0[%55] : memref<16xi32, #tpu.memory_space<smem>>
    %57 = arith.index_cast %c3_i32 : i32 to index
    %58 = memref.load %arg1[%57] : memref<16xi32, #tpu.memory_space<smem>>
    %59 = arith.index_cast %56 : i32 to index
    %c0_29 = arith.constant 0 : index
    %60 = vector.load %arg12[%59, %c0_29] : memref<8x128xf32, #tpu.memory_space<vmem>>, vector<1x128xf32>
    %61 = arith.index_cast %c3_i32 : i32 to index
    %c0_30 = arith.constant 0 : index
    %62 = vector.load %arg13[%61, %c0_30] : memref<16x128xf32, #tpu.memory_space<vmem>>, vector<1x128xf32>
    %63 = arith.addf %60, %62 : vector<1x128xf32>
    %64 = arith.index_cast %58 : i32 to index
    %c0_31 = arith.constant 0 : index
    %65 = vector.load %arg14[%64, %c0_31] : memref<8x128xf32, #tpu.memory_space<vmem>>, vector<1x128xf32>
    %66 = arith.addf %65, %63 : vector<1x128xf32>
    %67 = arith.index_cast %58 : i32 to index
    %c0_32 = arith.constant 0 : index
    %68 = vector.load %arg14[%67, %c0_32] : memref<8x128xf32, #tpu.memory_space<vmem>>, vector<1x128xf32>
    tpu.vector_store %arg14[%67, %c0_32], %66 {strides = array<i32>} : memref<8x128xf32, #tpu.memory_space<vmem>>, vector<1x128xf32>,
    %c4_i32 = arith.constant 4 : i32
    %69 = arith.index_cast %c4_i32 : i32 to index
    %70 = memref.load %arg0[%69] : memref<16xi32, #tpu.memory_space<smem>>
    %71 = arith.index_cast %c4_i32 : i32 to index
    %72 = memref.load %arg1[%71] : memref<16xi32, #tpu.memory_space<smem>>
    %73 = arith.index_cast %70 : i32 to index
    %c0_33 = arith.constant 0 : index
    %74 = vector.load %arg12[%73, %c0_33] : memref<8x128xf32, #tpu.memory_space<vmem>>, vector<1x128xf32>
    %75 = arith.index_cast %c4_i32 : i32 to index
    %c0_34 = arith.constant 0 : index
    %76 = vector.load %arg13[%75, %c0_34] : memref<16x128xf32, #tpu.memory_space<vmem>>, vector<1x128xf32>
    %77 = arith.addf %74, %76 : vector<1x128xf32>
    %78 = arith.index_cast %72 : i32 to index
    %c0_35 = arith.constant 0 : index
    %79 = vector.load %arg14[%78, %c0_35] : memref<8x128xf32, #tpu.memory_space<vmem>>, vector<1x128xf32>
    %80 = arith.addf %79, %77 : vector<1x128xf32>
    %81 = arith.index_cast %72 : i32 to index
    %c0_36 = arith.constant 0 : index
    %82 = vector.load %arg14[%81, %c0_36] : memref<8x128xf32, #tpu.memory_space<vmem>>, vector<1x128xf32>
    tpu.vector_store %arg14[%81, %c0_36], %80 {strides = array<i32>} : memref<8x128xf32, #tpu.memory_space<vmem>>, vector<1x128xf32>,
    %c5_i32 = arith.constant 5 : i32
    %83 = arith.index_cast %c5_i32 : i32 to index
    %84 = memref.load %arg0[%83] : memref<16xi32, #tpu.memory_space<smem>>
    %85 = arith.index_cast %c5_i32 : i32 to index
    %86 = memref.load %arg1[%85] : memref<16xi32, #tpu.memory_space<smem>>
    %87 = arith.index_cast %84 : i32 to index
    %c0_37 = arith.constant 0 : index
    %88 = vector.load %arg12[%87, %c0_37] : memref<8x128xf32, #tpu.memory_space<vmem>>, vector<1x128xf32>
    %89 = arith.index_cast %c5_i32 : i32 to index
    %c0_38 = arith.constant 0 : index
    %90 = vector.load %arg13[%89, %c0_38] : memref<16x128xf32, #tpu.memory_space<vmem>>, vector<1x128xf32>
    %91 = arith.addf %88, %90 : vector<1x128xf32>
    %92 = arith.index_cast %86 : i32 to index
    %c0_39 = arith.constant 0 : index
    %93 = vector.load %arg14[%92, %c0_39] : memref<8x128xf32, #tpu.memory_space<vmem>>, vector<1x128xf32>
    %94 = arith.addf %93, %91 : vector<1x128xf32>
    %95 = arith.index_cast %86 : i32 to index
    %c0_40 = arith.constant 0 : index
    %96 = vector.load %arg14[%95, %c0_40] : memref<8x128xf32, #tpu.memory_space<vmem>>, vector<1x128xf32>
    tpu.vector_store %arg14[%95, %c0_40], %94 {strides = array<i32>} : memref<8x128xf32, #tpu.memory_space<vmem>>, vector<1x128xf32>,
    %c6_i32 = arith.constant 6 : i32
    %97 = arith.index_cast %c6_i32 : i32 to index
    %98 = memref.load %arg0[%97] : memref<16xi32, #tpu.memory_space<smem>>
    %99 = arith.index_cast %c6_i32 : i32 to index
    %100 = memref.load %arg1[%99] : memref<16xi32, #tpu.memory_space<smem>>
    %101 = arith.index_cast %98 : i32 to index
    %c0_41 = arith.constant 0 : index
    %102 = vector.load %arg12[%101, %c0_41] : memref<8x128xf32, #tpu.memory_space<vmem>>, vector<1x128xf32>
    %103 = arith.index_cast %c6_i32 : i32 to index
    %c0_42 = arith.constant 0 : index
    %104 = vector.load %arg13[%103, %c0_42] : memref<16x128xf32, #tpu.memory_space<vmem>>, vector<1x128xf32>
    %105 = arith.addf %102, %104 : vector<1x128xf32>
    %106 = arith.index_cast %100 : i32 to index
    %c0_43 = arith.constant 0 : index
    %107 = vector.load %arg14[%106, %c0_43] : memref<8x128xf32, #tpu.memory_space<vmem>>, vector<1x128xf32>
    %108 = arith.addf %107, %105 : vector<1x128xf32>
    %109 = arith.index_cast %100 : i32 to index
    %c0_44 = arith.constant 0 : index
    %110 = vector.load %arg14[%109, %c0_44] : memref<8x128xf32, #tpu.memory_space<vmem>>, vector<1x128xf32>
    tpu.vector_store %arg14[%109, %c0_44], %108 {strides = array<i32>} : memref<8x128xf32, #tpu.memory_space<vmem>>, vector<1x128xf32>,
    %c7_i32 = arith.constant 7 : i32
    %111 = arith.index_cast %c7_i32 : i32 to index
    %112 = memref.load %arg0[%111] : memref<16xi32, #tpu.memory_space<smem>>
    %113 = arith.index_cast %c7_i32 : i32 to index
    %114 = memref.load %arg1[%113] : memref<16xi32, #tpu.memory_space<smem>>
    %115 = arith.index_cast %112 : i32 to index
    %c0_45 = arith.constant 0 : index
    %116 = vector.load %arg12[%115, %c0_45] : memref<8x128xf32, #tpu.memory_space<vmem>>, vector<1x128xf32>
    %117 = arith.index_cast %c7_i32 : i32 to index
    %c0_46 = arith.constant 0 : index
    %118 = vector.load %arg13[%117, %c0_46] : memref<16x128xf32, #tpu.memory_space<vmem>>, vector<1x128xf32>
    %119 = arith.addf %116, %118 : vector<1x128xf32>
    %120 = arith.index_cast %114 : i32 to index
    %c0_47 = arith.constant 0 : index
    %121 = vector.load %arg14[%120, %c0_47] : memref<8x128xf32, #tpu.memory_space<vmem>>, vector<1x128xf32>
    %122 = arith.addf %121, %119 : vector<1x128xf32>
    %123 = arith.index_cast %114 : i32 to index
    %c0_48 = arith.constant 0 : index
    %124 = vector.load %arg14[%123, %c0_48] : memref<8x128xf32, #tpu.memory_space<vmem>>, vector<1x128xf32>
    tpu.vector_store %arg14[%123, %c0_48], %122 {strides = array<i32>} : memref<8x128xf32, #tpu.memory_space<vmem>>, vector<1x128xf32>,
    %c8_i32 = arith.constant 8 : i32
    %125 = arith.index_cast %c8_i32 : i32 to index
    %126 = memref.load %arg0[%125] : memref<16xi32, #tpu.memory_space<smem>>
    %127 = arith.index_cast %c8_i32 : i32 to index
    %128 = memref.load %arg1[%127] : memref<16xi32, #tpu.memory_space<smem>>
    %129 = arith.index_cast %126 : i32 to index
    %c0_49 = arith.constant 0 : index
    %130 = vector.load %arg12[%129, %c0_49] : memref<8x128xf32, #tpu.memory_space<vmem>>, vector<1x128xf32>
    %131 = arith.index_cast %c8_i32 : i32 to index
    %c0_50 = arith.constant 0 : index
    %132 = vector.load %arg13[%131, %c0_50] : memref<16x128xf32, #tpu.memory_space<vmem>>, vector<1x128xf32>
    %133 = arith.addf %130, %132 : vector<1x128xf32>
    %134 = arith.index_cast %128 : i32 to index
    %c0_51 = arith.constant 0 : index
    %135 = vector.load %arg14[%134, %c0_51] : memref<8x128xf32, #tpu.memory_space<vmem>>, vector<1x128xf32>
    %136 = arith.addf %135, %133 : vector<1x128xf32>
    %137 = arith.index_cast %128 : i32 to index
    %c0_52 = arith.constant 0 : index
    %138 = vector.load %arg14[%137, %c0_52] : memref<8x128xf32, #tpu.memory_space<vmem>>, vector<1x128xf32>
    tpu.vector_store %arg14[%137, %c0_52], %136 {strides = array<i32>} : memref<8x128xf32, #tpu.memory_space<vmem>>, vector<1x128xf32>,
    %c9_i32 = arith.constant 9 : i32
    %139 = arith.index_cast %c9_i32 : i32 to index
    %140 = memref.load %arg0[%139] : memref<16xi32, #tpu.memory_space<smem>>
    %141 = arith.index_cast %c9_i32 : i32 to index
    %142 = memref.load %arg1[%141] : memref<16xi32, #tpu.memory_space<smem>>
    %143 = arith.index_cast %140 : i32 to index
    %c0_53 = arith.constant 0 : index
    %144 = vector.load %arg12[%143, %c0_53] : memref<8x128xf32, #tpu.memory_space<vmem>>, vector<1x128xf32>
    %145 = arith.index_cast %c9_i32 : i32 to index
    %c0_54 = arith.constant 0 : index
    %146 = vector.load %arg13[%145, %c0_54] : memref<16x128xf32, #tpu.memory_space<vmem>>, vector<1x128xf32>
    %147 = arith.addf %144, %146 : vector<1x128xf32>
    %148 = arith.index_cast %142 : i32 to index
    %c0_55 = arith.constant 0 : index
    %149 = vector.load %arg14[%148, %c0_55] : memref<8x128xf32, #tpu.memory_space<vmem>>, vector<1x128xf32>
    %150 = arith.addf %149, %147 : vector<1x128xf32>
    %151 = arith.index_cast %142 : i32 to index
    %c0_56 = arith.constant 0 : index
    %152 = vector.load %arg14[%151, %c0_56] : memref<8x128xf32, #tpu.memory_space<vmem>>, vector<1x128xf32>
    tpu.vector_store %arg14[%151, %c0_56], %150 {strides = array<i32>} : memref<8x128xf32, #tpu.memory_space<vmem>>, vector<1x128xf32>,
    %c10_i32 = arith.constant 10 : i32
    %153 = arith.index_cast %c10_i32 : i32 to index
    %154 = memref.load %arg0[%153] : memref<16xi32, #tpu.memory_space<smem>>
    %155 = arith.index_cast %c10_i32 : i32 to index
    %156 = memref.load %arg1[%155] : memref<16xi32, #tpu.memory_space<smem>>
    %157 = arith.index_cast %154 : i32 to index
    %c0_57 = arith.constant 0 : index
    %158 = vector.load %arg12[%157, %c0_57] : memref<8x128xf32, #tpu.memory_space<vmem>>, vector<1x128xf32>
    %159 = arith.index_cast %c10_i32 : i32 to index
    %c0_58 = arith.constant 0 : index
    %160 = vector.load %arg13[%159, %c0_58] : memref<16x128xf32, #tpu.memory_space<vmem>>, vector<1x128xf32>
    %161 = arith.addf %158, %160 : vector<1x128xf32>
    %162 = arith.index_cast %156 : i32 to index
    %c0_59 = arith.constant 0 : index
    %163 = vector.load %arg14[%162, %c0_59] : memref<8x128xf32, #tpu.memory_space<vmem>>, vector<1x128xf32>
    %164 = arith.addf %163, %161 : vector<1x128xf32>
    %165 = arith.index_cast %156 : i32 to index
    %c0_60 = arith.constant 0 : index
    %166 = vector.load %arg14[%165, %c0_60] : memref<8x128xf32, #tpu.memory_space<vmem>>, vector<1x128xf32>
    tpu.vector_store %arg14[%165, %c0_60], %164 {strides = array<i32>} : memref<8x128xf32, #tpu.memory_space<vmem>>, vector<1x128xf32>,
    %c11_i32 = arith.constant 11 : i32
    %167 = arith.index_cast %c11_i32 : i32 to index
    %168 = memref.load %arg0[%167] : memref<16xi32, #tpu.memory_space<smem>>
    %169 = arith.index_cast %c11_i32 : i32 to index
    %170 = memref.load %arg1[%169] : memref<16xi32, #tpu.memory_space<smem>>
    %171 = arith.index_cast %168 : i32 to index
    %c0_61 = arith.constant 0 : index
    %172 = vector.load %arg12[%171, %c0_61] : memref<8x128xf32, #tpu.memory_space<vmem>>, vector<1x128xf32>
    %173 = arith.index_cast %c11_i32 : i32 to index
    %c0_62 = arith.constant 0 : index
    %174 = vector.load %arg13[%173, %c0_62] : memref<16x128xf32, #tpu.memory_space<vmem>>, vector<1x128xf32>
    %175 = arith.addf %172, %174 : vector<1x128xf32>
    %176 = arith.index_cast %170 : i32 to index
    %c0_63 = arith.constant 0 : index
    %177 = vector.load %arg14[%176, %c0_63] : memref<8x128xf32, #tpu.memory_space<vmem>>, vector<1x128xf32>
    %178 = arith.addf %177, %175 : vector<1x128xf32>
    %179 = arith.index_cast %170 : i32 to index
    %c0_64 = arith.constant 0 : index
    %180 = vector.load %arg14[%179, %c0_64] : memref<8x128xf32, #tpu.memory_space<vmem>>, vector<1x128xf32>
    tpu.vector_store %arg14[%179, %c0_64], %178 {strides = array<i32>} : memref<8x128xf32, #tpu.memory_space<vmem>>, vector<1x128xf32>,
    %c12_i32 = arith.constant 12 : i32
    %181 = arith.index_cast %c12_i32 : i32 to index
    %182 = memref.load %arg0[%181] : memref<16xi32, #tpu.memory_space<smem>>
    %183 = arith.index_cast %c12_i32 : i32 to index
    %184 = memref.load %arg1[%183] : memref<16xi32, #tpu.memory_space<smem>>
    %185 = arith.index_cast %182 : i32 to index
    %c0_65 = arith.constant 0 : index
    %186 = vector.load %arg12[%185, %c0_65] : memref<8x128xf32, #tpu.memory_space<vmem>>, vector<1x128xf32>
    %187 = arith.index_cast %c12_i32 : i32 to index
    %c0_66 = arith.constant 0 : index
    %188 = vector.load %arg13[%187, %c0_66] : memref<16x128xf32, #tpu.memory_space<vmem>>, vector<1x128xf32>
    %189 = arith.addf %186, %188 : vector<1x128xf32>
    %190 = arith.index_cast %184 : i32 to index
    %c0_67 = arith.constant 0 : index
    %191 = vector.load %arg14[%190, %c0_67] : memref<8x128xf32, #tpu.memory_space<vmem>>, vector<1x128xf32>
    %192 = arith.addf %191, %189 : vector<1x128xf32>
    %193 = arith.index_cast %184 : i32 to index
    %c0_68 = arith.constant 0 : index
    %194 = vector.load %arg14[%193, %c0_68] : memref<8x128xf32, #tpu.memory_space<vmem>>, vector<1x128xf32>
    tpu.vector_store %arg14[%193, %c0_68], %192 {strides = array<i32>} : memref<8x128xf32, #tpu.memory_space<vmem>>, vector<1x128xf32>,
    %c13_i32 = arith.constant 13 : i32
    %195 = arith.index_cast %c13_i32 : i32 to index
    %196 = memref.load %arg0[%195] : memref<16xi32, #tpu.memory_space<smem>>
    %197 = arith.index_cast %c13_i32 : i32 to index
    %198 = memref.load %arg1[%197] : memref<16xi32, #tpu.memory_space<smem>>
    %199 = arith.index_cast %196 : i32 to index
    %c0_69 = arith.constant 0 : index
    %200 = vector.load %arg12[%199, %c0_69] : memref<8x128xf32, #tpu.memory_space<vmem>>, vector<1x128xf32>
    %201 = arith.index_cast %c13_i32 : i32 to index
    %c0_70 = arith.constant 0 : index
    %202 = vector.load %arg13[%201, %c0_70] : memref<16x128xf32, #tpu.memory_space<vmem>>, vector<1x128xf32>
    %203 = arith.addf %200, %202 : vector<1x128xf32>
    %204 = arith.index_cast %198 : i32 to index
    %c0_71 = arith.constant 0 : index
    %205 = vector.load %arg14[%204, %c0_71] : memref<8x128xf32, #tpu.memory_space<vmem>>, vector<1x128xf32>
    %206 = arith.addf %205, %203 : vector<1x128xf32>
    %207 = arith.index_cast %198 : i32 to index
    %c0_72 = arith.constant 0 : index
    %208 = vector.load %arg14[%207, %c0_72] : memref<8x128xf32, #tpu.memory_space<vmem>>, vector<1x128xf32>
    tpu.vector_store %arg14[%207, %c0_72], %206 {strides = array<i32>} : memref<8x128xf32, #tpu.memory_space<vmem>>, vector<1x128xf32>,
    %c14_i32 = arith.constant 14 : i32
    %209 = arith.index_cast %c14_i32 : i32 to index
    %210 = memref.load %arg0[%209] : memref<16xi32, #tpu.memory_space<smem>>
    %211 = arith.index_cast %c14_i32 : i32 to index
    %212 = memref.load %arg1[%211] : memref<16xi32, #tpu.memory_space<smem>>
    %213 = arith.index_cast %210 : i32 to index
    %c0_73 = arith.constant 0 : index
    %214 = vector.load %arg12[%213, %c0_73] : memref<8x128xf32, #tpu.memory_space<vmem>>, vector<1x128xf32>
    %215 = arith.index_cast %c14_i32 : i32 to index
    %c0_74 = arith.constant 0 : index
    %216 = vector.load %arg13[%215, %c0_74] : memref<16x128xf32, #tpu.memory_space<vmem>>, vector<1x128xf32>
    %217 = arith.addf %214, %216 : vector<1x128xf32>
    %218 = arith.index_cast %212 : i32 to index
    %c0_75 = arith.constant 0 : index
    %219 = vector.load %arg14[%218, %c0_75] : memref<8x128xf32, #tpu.memory_space<vmem>>, vector<1x128xf32>
    %220 = arith.addf %219, %217 : vector<1x128xf32>
    %221 = arith.index_cast %212 : i32 to index
    %c0_76 = arith.constant 0 : index
    %222 = vector.load %arg14[%221, %c0_76] : memref<8x128xf32, #tpu.memory_space<vmem>>, vector<1x128xf32>
    tpu.vector_store %arg14[%221, %c0_76], %220 {strides = array<i32>} : memref<8x128xf32, #tpu.memory_space<vmem>>, vector<1x128xf32>,
    %c15_i32 = arith.constant 15 : i32
    %223 = arith.index_cast %c15_i32 : i32 to index
    %224 = memref.load %arg0[%223] : memref<16xi32, #tpu.memory_space<smem>>
    %225 = arith.index_cast %c15_i32 : i32 to index
    %226 = memref.load %arg1[%225] : memref<16xi32, #tpu.memory_space<smem>>
    %227 = arith.index_cast %224 : i32 to index
    %c0_77 = arith.constant 0 : index
    %228 = vector.load %arg12[%227, %c0_77] : memref<8x128xf32, #tpu.memory_space<vmem>>, vector<1x128xf32>
    %229 = arith.index_cast %c15_i32 : i32 to index
    %c0_78 = arith.constant 0 : index
    %230 = vector.load %arg13[%229, %c0_78] : memref<16x128xf32, #tpu.memory_space<vmem>>, vector<1x128xf32>
    %231 = arith.addf %228, %230 : vector<1x128xf32>
    %232 = arith.index_cast %226 : i32 to index
    %c0_79 = arith.constant 0 : index
    %233 = vector.load %arg14[%232, %c0_79] : memref<8x128xf32, #tpu.memory_space<vmem>>, vector<1x128xf32>
    %234 = arith.addf %233, %231 : vector<1x128xf32>
    %235 = arith.index_cast %226 : i32 to index
    %c0_80 = arith.constant 0 : index
    %236 = vector.load %arg14[%235, %c0_80] : memref<8x128xf32, #tpu.memory_space<vmem>>, vector<1x128xf32>
    tpu.vector_store %arg14[%235, %c0_80], %234 {strides = array<i32>} : memref<8x128xf32, #tpu.memory_space<vmem>>, vector<1x128xf32>,
    %c16_i32 = arith.constant 16 : i32
    %c0_81 = arith.constant 0 : index
    %c0_82 = arith.constant 0 : index
    %237 = vector.load %arg14[%c0_81, %c0_82] : memref<8x128xf32, #tpu.memory_space<vmem>>, vector<8x128xf32>
    %c0_83 = arith.constant 0 : index
    %c0_84 = arith.constant 0 : index
    %238 = vector.load %arg4[%c0_83, %c0_84] : memref<8x1xf32, #tpu.memory_space<vmem>>, vector<8x1xf32>
    %239 = vector.broadcast %238 : vector<8x1xf32> to vector<8x128xf32>
    %240 = arith.mulf %237, %239 : vector<8x128xf32>
    %c0_85 = arith.constant 0 : index
    %c0_86 = arith.constant 0 : index
    %241 = vector.load %arg2[%c0_85, %c0_86] : memref<8x128xf32, #tpu.memory_space<vmem>>, vector<8x128xf32>
    %c0_87 = arith.constant 0 : index
    %c0_88 = arith.constant 0 : index
    %242 = vector.load %arg8[%c0_87, %c0_88] : memref<128x128xf32, #tpu.memory_space<vmem>>, vector<128x128xf32>
    %cst_89 = arith.constant dense<0.000000e+00> : vector<8x128xf32>
    %243 = tpu.matmul %241, %242, %cst_89 {dimension_numbers = #tpu.dot_dimension_numbers<[1], [0], [0], [1], [0, 0, 1, 1], [], []>} : vector<8x128xf32>, vector<128x128xf32>, vector<8x128xf32> -> vector<8x128xf32>
    %c0_90 = arith.constant 0 : index
    %c0_91 = arith.constant 0 : index
    %244 = vector.load %arg9[%c0_90, %c0_91] : memref<128x128xf32, #tpu.memory_space<vmem>>, vector<128x128xf32>
    %cst_92 = arith.constant dense<0.000000e+00> : vector<8x128xf32>
    %245 = tpu.matmul %240, %244, %cst_92 {dimension_numbers = #tpu.dot_dimension_numbers<[1], [0], [0], [1], [0, 0, 1, 1], [], []>} : vector<8x128xf32>, vector<128x128xf32>, vector<8x128xf32> -> vector<8x128xf32>
    %246 = arith.addf %243, %245 : vector<8x128xf32>
    %c0_93 = arith.constant 0 : index
    %c0_94 = arith.constant 0 : index
    %247 = vector.load %arg10[%c0_93, %c0_94] : memref<1x128xf32, #tpu.memory_space<vmem>>, vector<1x128xf32>
    %248 = vector.broadcast %247 : vector<1x128xf32> to vector<8x128xf32>
    %249 = arith.addf %246, %248 : vector<8x128xf32>
    %cst_95 = arith.constant 0.000000e+00 : f32
    %250 = vector.broadcast %cst_95 : f32 to vector<8x128xf32>
    %251 = arith.maximumf %249, %250 : vector<8x128xf32>
    %c0_96 = arith.constant 0 : index
    %c0_97 = arith.constant 0 : index
    %252 = vector.load %arg11[%c0_96, %c0_97] : memref<8x128xf32, #tpu.memory_space<vmem>>, vector<8x128xf32>
    tpu.vector_store %arg11[%c0_96, %c0_97], %251 {strides = array<i32>} : memref<8x128xf32, #tpu.memory_space<vmem>>, vector<8x128xf32>,
    return
  }
}

module attributes {stable_mosaic.version = 11 : i64} {
  func.func @_sage_layer_kernel(%arg0: memref<16xi32, #tpu.memory_space<smem>>, %arg1: memref<16xi32, #tpu.memory_space<smem>>, %arg2: memref<8x128xf32, #tpu.memory_space<vmem>>, %arg3: memref<16x128xf32, #tpu.memory_space<vmem>>, %arg4: memref<8x1xf32, #tpu.memory_space<vmem>>, %arg5: memref<128x128xf32, #tpu.memory_space<vmem>>, %arg6: memref<128x128xf32, #tpu.memory_space<vmem>>, %arg7: memref<1x128xf32, #tpu.memory_space<vmem>>, %arg8: memref<128x128xf32, #tpu.memory_space<vmem>>, %arg9: memref<128x128xf32, #tpu.memory_space<vmem>>, %arg10: memref<1x128xf32, #tpu.memory_space<vmem>>, %arg11: memref<8x128xf32, #tpu.memory_space<vmem>>, %arg12: memref<8x128xf32, #tpu.memory_space<vmem>>, %arg13: memref<16x128xf32, #tpu.memory_space<vmem>>, %arg14: memref<8x128xf32, #tpu.memory_space<vmem>>) attributes {dimension_semantics = [], scalar_prefetch = 0 : i64, scratch_operands = 3 : i64, tpu.core_type = #tpu.core_type<tc>} {
    %c0 = arith.constant 0 : index
    %c0_0 = arith.constant 0 : index
    %0 = vector.load %arg2[%c0, %c0_0] : memref<8x128xf32, #tpu.memory_space<vmem>>, vector<8x128xf32>
    %c0_1 = arith.constant 0 : index
    %c0_2 = arith.constant 0 : index
    %1 = vector.load %arg5[%c0_1, %c0_2] : memref<128x128xf32, #tpu.memory_space<vmem>>, vector<128x128xf32>
    %cst = arith.constant dense<0.000000e+00> : vector<8x128xf32>
    %2 = tpu.matmul %0, %1, %cst {dimension_numbers = #tpu.dot_dimension_numbers<[1], [0], [0], [1], [0, 0, 1, 1], [], []>} : vector<8x128xf32>, vector<128x128xf32>, vector<8x128xf32> -> vector<8x128xf32>
    %c0_3 = arith.constant 0 : index
    %c0_4 = arith.constant 0 : index
    %3 = vector.load %arg12[%c0_3, %c0_4] : memref<8x128xf32, #tpu.memory_space<vmem>>, vector<8x128xf32>
    tpu.vector_store %arg12[%c0_3, %c0_4], %2 {strides = array<i32>} : memref<8x128xf32, #tpu.memory_space<vmem>>, vector<8x128xf32>,
    %c0_5 = arith.constant 0 : index
    %c0_6 = arith.constant 0 : index
    %4 = vector.load %arg3[%c0_5, %c0_6] : memref<16x128xf32, #tpu.memory_space<vmem>>, vector<16x128xf32>
    %c0_7 = arith.constant 0 : index
    %c0_8 = arith.constant 0 : index
    %5 = vector.load %arg6[%c0_7, %c0_8] : memref<128x128xf32, #tpu.memory_space<vmem>>, vector<128x128xf32>
    %cst_9 = arith.constant dense<0.000000e+00> : vector<16x128xf32>
    %6 = tpu.matmul %4, %5, %cst_9 {dimension_numbers = #tpu.dot_dimension_numbers<[1], [0], [0], [1], [0, 0, 1, 1], [], []>} : vector<16x128xf32>, vector<128x128xf32>, vector<16x128xf32> -> vector<16x128xf32>
    %c0_10 = arith.constant 0 : index
    %c0_11 = arith.constant 0 : index
    %7 = vector.load %arg7[%c0_10, %c0_11] : memref<1x128xf32, #tpu.memory_space<vmem>>, vector<1x128xf32>
    %8 = vector.broadcast %7 : vector<1x128xf32> to vector<16x128xf32>
    %9 = arith.addf %6, %8 : vector<16x128xf32>
    %c0_12 = arith.constant 0 : index
    %c0_13 = arith.constant 0 : index
    %10 = vector.load %arg13[%c0_12, %c0_13] : memref<16x128xf32, #tpu.memory_space<vmem>>, vector<16x128xf32>
    tpu.vector_store %arg13[%c0_12, %c0_13], %9 {strides = array<i32>} : memref<16x128xf32, #tpu.memory_space<vmem>>, vector<16x128xf32>,
    %cst_14 = arith.constant 0.000000e+00 : f32
    %11 = vector.broadcast %cst_14 : f32 to vector<8x128xf32>
    %c0_15 = arith.constant 0 : index
    %c0_16 = arith.constant 0 : index
    %12 = vector.load %arg14[%c0_15, %c0_16] : memref<8x128xf32, #tpu.memory_space<vmem>>, vector<8x128xf32>
    tpu.vector_store %arg14[%c0_15, %c0_16], %11 {strides = array<i32>} : memref<8x128xf32, #tpu.memory_space<vmem>>, vector<8x128xf32>,
    %c0_i32 = arith.constant 0 : i32
    %13 = arith.index_cast %c0_i32 : i32 to index
    %14 = memref.load %arg0[%13] : memref<16xi32, #tpu.memory_space<smem>>
    %15 = arith.index_cast %c0_i32 : i32 to index
    %16 = memref.load %arg1[%15] : memref<16xi32, #tpu.memory_space<smem>>
    %17 = arith.index_cast %14 : i32 to index
    %c0_17 = arith.constant 0 : index
    %18 = vector.load %arg12[%17, %c0_17] : memref<8x128xf32, #tpu.memory_space<vmem>>, vector<1x128xf32>
    %19 = arith.index_cast %c0_i32 : i32 to index
    %c0_18 = arith.constant 0 : index
    %20 = vector.load %arg13[%19, %c0_18] : memref<16x128xf32, #tpu.memory_space<vmem>>, vector<1x128xf32>
    %21 = arith.addf %18, %20 : vector<1x128xf32>
    %22 = arith.index_cast %16 : i32 to index
    %c0_19 = arith.constant 0 : index
    %23 = vector.load %arg14[%22, %c0_19] : memref<8x128xf32, #tpu.memory_space<vmem>>, vector<1x128xf32>
    %24 = arith.addf %23, %21 : vector<1x128xf32>
    %25 = arith.index_cast %16 : i32 to index
    %c0_20 = arith.constant 0 : index
    %26 = vector.load %arg14[%25, %c0_20] : memref<8x128xf32, #tpu.memory_space<vmem>>, vector<1x128xf32>
    tpu.vector_store %arg14[%25, %c0_20], %24 {strides = array<i32>} : memref<8x128xf32, #tpu.memory_space<vmem>>, vector<1x128xf32>,
    %c1_i32 = arith.constant 1 : i32
    %27 = arith.index_cast %c1_i32 : i32 to index
    %28 = memref.load %arg0[%27] : memref<16xi32, #tpu.memory_space<smem>>
    %29 = arith.index_cast %c1_i32 : i32 to index
    %30 = memref.load %arg1[%29] : memref<16xi32, #tpu.memory_space<smem>>
    %31 = arith.index_cast %28 : i32 to index
    %c0_21 = arith.constant 0 : index
    %32 = vector.load %arg12[%31, %c0_21] : memref<8x128xf32, #tpu.memory_space<vmem>>, vector<1x128xf32>
    %33 = arith.index_cast %c1_i32 : i32 to index
    %c0_22 = arith.constant 0 : index
    %34 = vector.load %arg13[%33, %c0_22] : memref<16x128xf32, #tpu.memory_space<vmem>>, vector<1x128xf32>
    %35 = arith.addf %32, %34 : vector<1x128xf32>
    %36 = arith.index_cast %30 : i32 to index
    %c0_23 = arith.constant 0 : index
    %37 = vector.load %arg14[%36, %c0_23] : memref<8x128xf32, #tpu.memory_space<vmem>>, vector<1x128xf32>
    %38 = arith.addf %37, %35 : vector<1x128xf32>
    %39 = arith.index_cast %30 : i32 to index
    %c0_24 = arith.constant 0 : index
    %40 = vector.load %arg14[%39, %c0_24] : memref<8x128xf32, #tpu.memory_space<vmem>>, vector<1x128xf32>
    tpu.vector_store %arg14[%39, %c0_24], %38 {strides = array<i32>} : memref<8x128xf32, #tpu.memory_space<vmem>>, vector<1x128xf32>,
    %c2_i32 = arith.constant 2 : i32
    %41 = arith.index_cast %c2_i32 : i32 to index
    %42 = memref.load %arg0[%41] : memref<16xi32, #tpu.memory_space<smem>>
    %43 = arith.index_cast %c2_i32 : i32 to index
    %44 = memref.load %arg1[%43] : memref<16xi32, #tpu.memory_space<smem>>
    %45 = arith.index_cast %42 : i32 to index
    %c0_25 = arith.constant 0 : index
    %46 = vector.load %arg12[%45, %c0_25] : memref<8x128xf32, #tpu.memory_space<vmem>>, vector<1x128xf32>
    %47 = arith.index_cast %c2_i32 : i32 to index
    %c0_26 = arith.constant 0 : index
    %48 = vector.load %arg13[%47, %c0_26] : memref<16x128xf32, #tpu.memory_space<vmem>>, vector<1x128xf32>
    %49 = arith.addf %46, %48 : vector<1x128xf32>
    %50 = arith.index_cast %44 : i32 to index
    %c0_27 = arith.constant 0 : index
    %51 = vector.load %arg14[%50, %c0_27] : memref<8x128xf32, #tpu.memory_space<vmem>>, vector<1x128xf32>
    %52 = arith.addf %51, %49 : vector<1x128xf32>
    %53 = arith.index_cast %44 : i32 to index
    %c0_28 = arith.constant 0 : index
    %54 = vector.load %arg14[%53, %c0_28] : memref<8x128xf32, #tpu.memory_space<vmem>>, vector<1x128xf32>
    tpu.vector_store %arg14[%53, %c0_28], %52 {strides = array<i32>} : memref<8x128xf32, #tpu.memory_space<vmem>>, vector<1x128xf32>,
    %c3_i32 = arith.constant 3 : i32
    %55 = arith.index_cast %c3_i32 : i32 to index
    %56 = memref.load %arg0[%55] : memref<16xi32, #tpu.memory_space<smem>>
    %57 = arith.index_cast %c3_i32 : i32 to index
    %58 = memref.load %arg1[%57] : memref<16xi32, #tpu.memory_space<smem>>
    %59 = arith.index_cast %56 : i32 to index
    %c0_29 = arith.constant 0 : index
    %60 = vector.load %arg12[%59, %c0_29] : memref<8x128xf32, #tpu.memory_space<vmem>>, vector<1x128xf32>
    %61 = arith.index_cast %c3_i32 : i32 to index
    %c0_30 = arith.constant 0 : index
    %62 = vector.load %arg13[%61, %c0_30] : memref<16x128xf32, #tpu.memory_space<vmem>>, vector<1x128xf32>
    %63 = arith.addf %60, %62 : vector<1x128xf32>
    %64 = arith.index_cast %58 : i32 to index
    %c0_31 = arith.constant 0 : index
    %65 = vector.load %arg14[%64, %c0_31] : memref<8x128xf32, #tpu.memory_space<vmem>>, vector<1x128xf32>
    %66 = arith.addf %65, %63 : vector<1x128xf32>
    %67 = arith.index_cast %58 : i32 to index
    %c0_32 = arith.constant 0 : index
    %68 = vector.load %arg14[%67, %c0_32] : memref<8x128xf32, #tpu.memory_space<vmem>>, vector<1x128xf32>
    tpu.vector_store %arg14[%67, %c0_32], %66 {strides = array<i32>} : memref<8x128xf32, #tpu.memory_space<vmem>>, vector<1x128xf32>,
    %c4_i32 = arith.constant 4 : i32
    %69 = arith.index_cast %c4_i32 : i32 to index
    %70 = memref.load %arg0[%69] : memref<16xi32, #tpu.memory_space<smem>>
    %71 = arith.index_cast %c4_i32 : i32 to index
    %72 = memref.load %arg1[%71] : memref<16xi32, #tpu.memory_space<smem>>
    %73 = arith.index_cast %70 : i32 to index
    %c0_33 = arith.constant 0 : index
    %74 = vector.load %arg12[%73, %c0_33] : memref<8x128xf32, #tpu.memory_space<vmem>>, vector<1x128xf32>
    %75 = arith.index_cast %c4_i32 : i32 to index
    %c0_34 = arith.constant 0 : index
    %76 = vector.load %arg13[%75, %c0_34] : memref<16x128xf32, #tpu.memory_space<vmem>>, vector<1x128xf32>
    %77 = arith.addf %74, %76 : vector<1x128xf32>
    %78 = arith.index_cast %72 : i32 to index
    %c0_35 = arith.constant 0 : index
    %79 = vector.load %arg14[%78, %c0_35] : memref<8x128xf32, #tpu.memory_space<vmem>>, vector<1x128xf32>
    %80 = arith.addf %79, %77 : vector<1x128xf32>
    %81 = arith.index_cast %72 : i32 to index
    %c0_36 = arith.constant 0 : index
    %82 = vector.load %arg14[%81, %c0_36] : memref<8x128xf32, #tpu.memory_space<vmem>>, vector<1x128xf32>
    tpu.vector_store %arg14[%81, %c0_36], %80 {strides = array<i32>} : memref<8x128xf32, #tpu.memory_space<vmem>>, vector<1x128xf32>,
    %c5_i32 = arith.constant 5 : i32
    %83 = arith.index_cast %c5_i32 : i32 to index
    %84 = memref.load %arg0[%83] : memref<16xi32, #tpu.memory_space<smem>>
    %85 = arith.index_cast %c5_i32 : i32 to index
    %86 = memref.load %arg1[%85] : memref<16xi32, #tpu.memory_space<smem>>
    %87 = arith.index_cast %84 : i32 to index
    %c0_37 = arith.constant 0 : index
    %88 = vector.load %arg12[%87, %c0_37] : memref<8x128xf32, #tpu.memory_space<vmem>>, vector<1x128xf32>
    %89 = arith.index_cast %c5_i32 : i32 to index
    %c0_38 = arith.constant 0 : index
    %90 = vector.load %arg13[%89, %c0_38] : memref<16x128xf32, #tpu.memory_space<vmem>>, vector<1x128xf32>
    %91 = arith.addf %88, %90 : vector<1x128xf32>
    %92 = arith.index_cast %86 : i32 to index
    %c0_39 = arith.constant 0 : index
    %93 = vector.load %arg14[%92, %c0_39] : memref<8x128xf32, #tpu.memory_space<vmem>>, vector<1x128xf32>
    %94 = arith.addf %93, %91 : vector<1x128xf32>
    %95 = arith.index_cast %86 : i32 to index
    %c0_40 = arith.constant 0 : index
    %96 = vector.load %arg14[%95, %c0_40] : memref<8x128xf32, #tpu.memory_space<vmem>>, vector<1x128xf32>
    tpu.vector_store %arg14[%95, %c0_40], %94 {strides = array<i32>} : memref<8x128xf32, #tpu.memory_space<vmem>>, vector<1x128xf32>,
    %c6_i32 = arith.constant 6 : i32
    %97 = arith.index_cast %c6_i32 : i32 to index
    %98 = memref.load %arg0[%97] : memref<16xi32, #tpu.memory_space<smem>>
    %99 = arith.index_cast %c6_i32 : i32 to index
    %100 = memref.load %arg1[%99] : memref<16xi32, #tpu.memory_space<smem>>
    %101 = arith.index_cast %98 : i32 to index
    %c0_41 = arith.constant 0 : index
    %102 = vector.load %arg12[%101, %c0_41] : memref<8x128xf32, #tpu.memory_space<vmem>>, vector<1x128xf32>
    %103 = arith.index_cast %c6_i32 : i32 to index
    %c0_42 = arith.constant 0 : index
    %104 = vector.load %arg13[%103, %c0_42] : memref<16x128xf32, #tpu.memory_space<vmem>>, vector<1x128xf32>
    %105 = arith.addf %102, %104 : vector<1x128xf32>
    %106 = arith.index_cast %100 : i32 to index
    %c0_43 = arith.constant 0 : index
    %107 = vector.load %arg14[%106, %c0_43] : memref<8x128xf32, #tpu.memory_space<vmem>>, vector<1x128xf32>
    %108 = arith.addf %107, %105 : vector<1x128xf32>
    %109 = arith.index_cast %100 : i32 to index
    %c0_44 = arith.constant 0 : index
    %110 = vector.load %arg14[%109, %c0_44] : memref<8x128xf32, #tpu.memory_space<vmem>>, vector<1x128xf32>
    tpu.vector_store %arg14[%109, %c0_44], %108 {strides = array<i32>} : memref<8x128xf32, #tpu.memory_space<vmem>>, vector<1x128xf32>,
    %c7_i32 = arith.constant 7 : i32
    %111 = arith.index_cast %c7_i32 : i32 to index
    %112 = memref.load %arg0[%111] : memref<16xi32, #tpu.memory_space<smem>>
    %113 = arith.index_cast %c7_i32 : i32 to index
    %114 = memref.load %arg1[%113] : memref<16xi32, #tpu.memory_space<smem>>
    %115 = arith.index_cast %112 : i32 to index
    %c0_45 = arith.constant 0 : index
    %116 = vector.load %arg12[%115, %c0_45] : memref<8x128xf32, #tpu.memory_space<vmem>>, vector<1x128xf32>
    %117 = arith.index_cast %c7_i32 : i32 to index
    %c0_46 = arith.constant 0 : index
    %118 = vector.load %arg13[%117, %c0_46] : memref<16x128xf32, #tpu.memory_space<vmem>>, vector<1x128xf32>
    %119 = arith.addf %116, %118 : vector<1x128xf32>
    %120 = arith.index_cast %114 : i32 to index
    %c0_47 = arith.constant 0 : index
    %121 = vector.load %arg14[%120, %c0_47] : memref<8x128xf32, #tpu.memory_space<vmem>>, vector<1x128xf32>
    %122 = arith.addf %121, %119 : vector<1x128xf32>
    %123 = arith.index_cast %114 : i32 to index
    %c0_48 = arith.constant 0 : index
    %124 = vector.load %arg14[%123, %c0_48] : memref<8x128xf32, #tpu.memory_space<vmem>>, vector<1x128xf32>
    tpu.vector_store %arg14[%123, %c0_48], %122 {strides = array<i32>} : memref<8x128xf32, #tpu.memory_space<vmem>>, vector<1x128xf32>,
    %c8_i32 = arith.constant 8 : i32
    %125 = arith.index_cast %c8_i32 : i32 to index
    %126 = memref.load %arg0[%125] : memref<16xi32, #tpu.memory_space<smem>>
    %127 = arith.index_cast %c8_i32 : i32 to index
    %128 = memref.load %arg1[%127] : memref<16xi32, #tpu.memory_space<smem>>
    %129 = arith.index_cast %126 : i32 to index
    %c0_49 = arith.constant 0 : index
    %130 = vector.load %arg12[%129, %c0_49] : memref<8x128xf32, #tpu.memory_space<vmem>>, vector<1x128xf32>
    %131 = arith.index_cast %c8_i32 : i32 to index
    %c0_50 = arith.constant 0 : index
    %132 = vector.load %arg13[%131, %c0_50] : memref<16x128xf32, #tpu.memory_space<vmem>>, vector<1x128xf32>
    %133 = arith.addf %130, %132 : vector<1x128xf32>
    %134 = arith.index_cast %128 : i32 to index
    %c0_51 = arith.constant 0 : index
    %135 = vector.load %arg14[%134, %c0_51] : memref<8x128xf32, #tpu.memory_space<vmem>>, vector<1x128xf32>
    %136 = arith.addf %135, %133 : vector<1x128xf32>
    %137 = arith.index_cast %128 : i32 to index
    %c0_52 = arith.constant 0 : index
    %138 = vector.load %arg14[%137, %c0_52] : memref<8x128xf32, #tpu.memory_space<vmem>>, vector<1x128xf32>
    tpu.vector_store %arg14[%137, %c0_52], %136 {strides = array<i32>} : memref<8x128xf32, #tpu.memory_space<vmem>>, vector<1x128xf32>,
    %c9_i32 = arith.constant 9 : i32
    %139 = arith.index_cast %c9_i32 : i32 to index
    %140 = memref.load %arg0[%139] : memref<16xi32, #tpu.memory_space<smem>>
    %141 = arith.index_cast %c9_i32 : i32 to index
    %142 = memref.load %arg1[%141] : memref<16xi32, #tpu.memory_space<smem>>
    %143 = arith.index_cast %140 : i32 to index
    %c0_53 = arith.constant 0 : index
    %144 = vector.load %arg12[%143, %c0_53] : memref<8x128xf32, #tpu.memory_space<vmem>>, vector<1x128xf32>
    %145 = arith.index_cast %c9_i32 : i32 to index
    %c0_54 = arith.constant 0 : index
    %146 = vector.load %arg13[%145, %c0_54] : memref<16x128xf32, #tpu.memory_space<vmem>>, vector<1x128xf32>
    %147 = arith.addf %144, %146 : vector<1x128xf32>
    %148 = arith.index_cast %142 : i32 to index
    %c0_55 = arith.constant 0 : index
    %149 = vector.load %arg14[%148, %c0_55] : memref<8x128xf32, #tpu.memory_space<vmem>>, vector<1x128xf32>
    %150 = arith.addf %149, %147 : vector<1x128xf32>
    %151 = arith.index_cast %142 : i32 to index
    %c0_56 = arith.constant 0 : index
    %152 = vector.load %arg14[%151, %c0_56] : memref<8x128xf32, #tpu.memory_space<vmem>>, vector<1x128xf32>
    tpu.vector_store %arg14[%151, %c0_56], %150 {strides = array<i32>} : memref<8x128xf32, #tpu.memory_space<vmem>>, vector<1x128xf32>,
    %c10_i32 = arith.constant 10 : i32
    %153 = arith.index_cast %c10_i32 : i32 to index
    %154 = memref.load %arg0[%153] : memref<16xi32, #tpu.memory_space<smem>>
    %155 = arith.index_cast %c10_i32 : i32 to index
    %156 = memref.load %arg1[%155] : memref<16xi32, #tpu.memory_space<smem>>
    %157 = arith.index_cast %154 : i32 to index
    %c0_57 = arith.constant 0 : index
    %158 = vector.load %arg12[%157, %c0_57] : memref<8x128xf32, #tpu.memory_space<vmem>>, vector<1x128xf32>
    %159 = arith.index_cast %c10_i32 : i32 to index
    %c0_58 = arith.constant 0 : index
    %160 = vector.load %arg13[%159, %c0_58] : memref<16x128xf32, #tpu.memory_space<vmem>>, vector<1x128xf32>
    %161 = arith.addf %158, %160 : vector<1x128xf32>
    %162 = arith.index_cast %156 : i32 to index
    %c0_59 = arith.constant 0 : index
    %163 = vector.load %arg14[%162, %c0_59] : memref<8x128xf32, #tpu.memory_space<vmem>>, vector<1x128xf32>
    %164 = arith.addf %163, %161 : vector<1x128xf32>
    %165 = arith.index_cast %156 : i32 to index
    %c0_60 = arith.constant 0 : index
    %166 = vector.load %arg14[%165, %c0_60] : memref<8x128xf32, #tpu.memory_space<vmem>>, vector<1x128xf32>
    tpu.vector_store %arg14[%165, %c0_60], %164 {strides = array<i32>} : memref<8x128xf32, #tpu.memory_space<vmem>>, vector<1x128xf32>,
    %c11_i32 = arith.constant 11 : i32
    %167 = arith.index_cast %c11_i32 : i32 to index
    %168 = memref.load %arg0[%167] : memref<16xi32, #tpu.memory_space<smem>>
    %169 = arith.index_cast %c11_i32 : i32 to index
    %170 = memref.load %arg1[%169] : memref<16xi32, #tpu.memory_space<smem>>
    %171 = arith.index_cast %168 : i32 to index
    %c0_61 = arith.constant 0 : index
    %172 = vector.load %arg12[%171, %c0_61] : memref<8x128xf32, #tpu.memory_space<vmem>>, vector<1x128xf32>
    %173 = arith.index_cast %c11_i32 : i32 to index
    %c0_62 = arith.constant 0 : index
    %174 = vector.load %arg13[%173, %c0_62] : memref<16x128xf32, #tpu.memory_space<vmem>>, vector<1x128xf32>
    %175 = arith.addf %172, %174 : vector<1x128xf32>
    %176 = arith.index_cast %170 : i32 to index
    %c0_63 = arith.constant 0 : index
    %177 = vector.load %arg14[%176, %c0_63] : memref<8x128xf32, #tpu.memory_space<vmem>>, vector<1x128xf32>
    %178 = arith.addf %177, %175 : vector<1x128xf32>
    %179 = arith.index_cast %170 : i32 to index
    %c0_64 = arith.constant 0 : index
    %180 = vector.load %arg14[%179, %c0_64] : memref<8x128xf32, #tpu.memory_space<vmem>>, vector<1x128xf32>
    tpu.vector_store %arg14[%179, %c0_64], %178 {strides = array<i32>} : memref<8x128xf32, #tpu.memory_space<vmem>>, vector<1x128xf32>,
    %c12_i32 = arith.constant 12 : i32
    %181 = arith.index_cast %c12_i32 : i32 to index
    %182 = memref.load %arg0[%181] : memref<16xi32, #tpu.memory_space<smem>>
    %183 = arith.index_cast %c12_i32 : i32 to index
    %184 = memref.load %arg1[%183] : memref<16xi32, #tpu.memory_space<smem>>
    %185 = arith.index_cast %182 : i32 to index
    %c0_65 = arith.constant 0 : index
    %186 = vector.load %arg12[%185, %c0_65] : memref<8x128xf32, #tpu.memory_space<vmem>>, vector<1x128xf32>
    %187 = arith.index_cast %c12_i32 : i32 to index
    %c0_66 = arith.constant 0 : index
    %188 = vector.load %arg13[%187, %c0_66] : memref<16x128xf32, #tpu.memory_space<vmem>>, vector<1x128xf32>
    %189 = arith.addf %186, %188 : vector<1x128xf32>
    %190 = arith.index_cast %184 : i32 to index
    %c0_67 = arith.constant 0 : index
    %191 = vector.load %arg14[%190, %c0_67] : memref<8x128xf32, #tpu.memory_space<vmem>>, vector<1x128xf32>
    %192 = arith.addf %191, %189 : vector<1x128xf32>
    %193 = arith.index_cast %184 : i32 to index
    %c0_68 = arith.constant 0 : index
    %194 = vector.load %arg14[%193, %c0_68] : memref<8x128xf32, #tpu.memory_space<vmem>>, vector<1x128xf32>
    tpu.vector_store %arg14[%193, %c0_68], %192 {strides = array<i32>} : memref<8x128xf32, #tpu.memory_space<vmem>>, vector<1x128xf32>,
    %c13_i32 = arith.constant 13 : i32
    %195 = arith.index_cast %c13_i32 : i32 to index
    %196 = memref.load %arg0[%195] : memref<16xi32, #tpu.memory_space<smem>>
    %197 = arith.index_cast %c13_i32 : i32 to index
    %198 = memref.load %arg1[%197] : memref<16xi32, #tpu.memory_space<smem>>
    %199 = arith.index_cast %196 : i32 to index
    %c0_69 = arith.constant 0 : index
    %200 = vector.load %arg12[%199, %c0_69] : memref<8x128xf32, #tpu.memory_space<vmem>>, vector<1x128xf32>
    %201 = arith.index_cast %c13_i32 : i32 to index
    %c0_70 = arith.constant 0 : index
    %202 = vector.load %arg13[%201, %c0_70] : memref<16x128xf32, #tpu.memory_space<vmem>>, vector<1x128xf32>
    %203 = arith.addf %200, %202 : vector<1x128xf32>
    %204 = arith.index_cast %198 : i32 to index
    %c0_71 = arith.constant 0 : index
    %205 = vector.load %arg14[%204, %c0_71] : memref<8x128xf32, #tpu.memory_space<vmem>>, vector<1x128xf32>
    %206 = arith.addf %205, %203 : vector<1x128xf32>
    %207 = arith.index_cast %198 : i32 to index
    %c0_72 = arith.constant 0 : index
    %208 = vector.load %arg14[%207, %c0_72] : memref<8x128xf32, #tpu.memory_space<vmem>>, vector<1x128xf32>
    tpu.vector_store %arg14[%207, %c0_72], %206 {strides = array<i32>} : memref<8x128xf32, #tpu.memory_space<vmem>>, vector<1x128xf32>,
    %c14_i32 = arith.constant 14 : i32
    %209 = arith.index_cast %c14_i32 : i32 to index
    %210 = memref.load %arg0[%209] : memref<16xi32, #tpu.memory_space<smem>>
    %211 = arith.index_cast %c14_i32 : i32 to index
    %212 = memref.load %arg1[%211] : memref<16xi32, #tpu.memory_space<smem>>
    %213 = arith.index_cast %210 : i32 to index
    %c0_73 = arith.constant 0 : index
    %214 = vector.load %arg12[%213, %c0_73] : memref<8x128xf32, #tpu.memory_space<vmem>>, vector<1x128xf32>
    %215 = arith.index_cast %c14_i32 : i32 to index
    %c0_74 = arith.constant 0 : index
    %216 = vector.load %arg13[%215, %c0_74] : memref<16x128xf32, #tpu.memory_space<vmem>>, vector<1x128xf32>
    %217 = arith.addf %214, %216 : vector<1x128xf32>
    %218 = arith.index_cast %212 : i32 to index
    %c0_75 = arith.constant 0 : index
    %219 = vector.load %arg14[%218, %c0_75] : memref<8x128xf32, #tpu.memory_space<vmem>>, vector<1x128xf32>
    %220 = arith.addf %219, %217 : vector<1x128xf32>
    %221 = arith.index_cast %212 : i32 to index
    %c0_76 = arith.constant 0 : index
    %222 = vector.load %arg14[%221, %c0_76] : memref<8x128xf32, #tpu.memory_space<vmem>>, vector<1x128xf32>
    tpu.vector_store %arg14[%221, %c0_76], %220 {strides = array<i32>} : memref<8x128xf32, #tpu.memory_space<vmem>>, vector<1x128xf32>,
    %c15_i32 = arith.constant 15 : i32
    %223 = arith.index_cast %c15_i32 : i32 to index
    %224 = memref.load %arg0[%223] : memref<16xi32, #tpu.memory_space<smem>>
    %225 = arith.index_cast %c15_i32 : i32 to index
    %226 = memref.load %arg1[%225] : memref<16xi32, #tpu.memory_space<smem>>
    %227 = arith.index_cast %224 : i32 to index
    %c0_77 = arith.constant 0 : index
    %228 = vector.load %arg12[%227, %c0_77] : memref<8x128xf32, #tpu.memory_space<vmem>>, vector<1x128xf32>
    %229 = arith.index_cast %c15_i32 : i32 to index
    %c0_78 = arith.constant 0 : index
    %230 = vector.load %arg13[%229, %c0_78] : memref<16x128xf32, #tpu.memory_space<vmem>>, vector<1x128xf32>
    %231 = arith.addf %228, %230 : vector<1x128xf32>
    %232 = arith.index_cast %226 : i32 to index
    %c0_79 = arith.constant 0 : index
    %233 = vector.load %arg14[%232, %c0_79] : memref<8x128xf32, #tpu.memory_space<vmem>>, vector<1x128xf32>
    %234 = arith.addf %233, %231 : vector<1x128xf32>
    %235 = arith.index_cast %226 : i32 to index
    %c0_80 = arith.constant 0 : index
    %236 = vector.load %arg14[%235, %c0_80] : memref<8x128xf32, #tpu.memory_space<vmem>>, vector<1x128xf32>
    tpu.vector_store %arg14[%235, %c0_80], %234 {strides = array<i32>} : memref<8x128xf32, #tpu.memory_space<vmem>>, vector<1x128xf32>,
    %c16_i32 = arith.constant 16 : i32
    %c0_81 = arith.constant 0 : index
    %c0_82 = arith.constant 0 : index
    %237 = vector.load %arg14[%c0_81, %c0_82] : memref<8x128xf32, #tpu.memory_space<vmem>>, vector<8x128xf32>
    %c0_83 = arith.constant 0 : index
    %c0_84 = arith.constant 0 : index
    %238 = vector.load %arg4[%c0_83, %c0_84] : memref<8x1xf32, #tpu.memory_space<vmem>>, vector<8x1xf32>
    %239 = vector.broadcast %238 : vector<8x1xf32> to vector<8x128xf32>
    %240 = arith.mulf %237, %239 : vector<8x128xf32>
    %c0_85 = arith.constant 0 : index
    %c0_86 = arith.constant 0 : index
    %241 = vector.load %arg2[%c0_85, %c0_86] : memref<8x128xf32, #tpu.memory_space<vmem>>, vector<8x128xf32>
    %c0_87 = arith.constant 0 : index
    %c0_88 = arith.constant 0 : index
    %242 = vector.load %arg8[%c0_87, %c0_88] : memref<128x128xf32, #tpu.memory_space<vmem>>, vector<128x128xf32>
    %cst_89 = arith.constant dense<0.000000e+00> : vector<8x128xf32>
    %243 = tpu.matmul %241, %242, %cst_89 {dimension_numbers = #tpu.dot_dimension_numbers<[1], [0], [0], [1], [0, 0, 1, 1], [], []>} : vector<8x128xf32>, vector<128x128xf32>, vector<8x128xf32> -> vector<8x128xf32>
    %c0_90 = arith.constant 0 : index
    %c0_91 = arith.constant 0 : index
    %244 = vector.load %arg9[%c0_90, %c0_91] : memref<128x128xf32, #tpu.memory_space<vmem>>, vector<128x128xf32>
    %cst_92 = arith.constant dense<0.000000e+00> : vector<8x128xf32>
    %245 = tpu.matmul %240, %244, %cst_92 {dimension_numbers = #tpu.dot_dimension_numbers<[1], [0], [0], [1], [0, 0, 1, 1], [], []>} : vector<8x128xf32>, vector<128x128xf32>, vector<8x128xf32> -> vector<8x128xf32>
    %246 = arith.addf %243, %245 : vector<8x128xf32>
    %c0_93 = arith.constant 0 : index
    %c0_94 = arith.constant 0 : index
    %247 = vector.load %arg10[%c0_93, %c0_94] : memref<1x128xf32, #tpu.memory_space<vmem>>, vector<1x128xf32>
    %248 = vector.broadcast %247 : vector<1x128xf32> to vector<8x128xf32>
    %249 = arith.addf %246, %248 : vector<8x128xf32>
    %cst_95 = arith.constant 0.000000e+00 : f32
    %250 = vector.broadcast %cst_95 : f32 to vector<8x128xf32>
    %251 = arith.maximumf %249, %250 : vector<8x128xf32>
    %c0_96 = arith.constant 0 : index
    %c0_97 = arith.constant 0 : index
    %252 = vector.load %arg11[%c0_96, %c0_97] : memref<8x128xf32, #tpu.memory_space<vmem>>, vector<8x128xf32>
    tpu.vector_store %arg11[%c0_96, %c0_97], %251 {strides = array<i32>} : memref<8x128xf32, #tpu.memory_space<vmem>>, vector<8x128xf32>,
    return
  }
}

</mosaic_0001>

<bundles_post_ra>
// kernel: sage_forward.5
= control target key start
LH: loop header
LB: loop body
LE: loop exit
PB: predicated region body
PF: predicated region fallthrough
CT: control target
= control target key end

     0   :  { %16 = vsyncpa [#allocation7], 0  ;;  %s1404_s0 = inlined_call_operand.vmem [shape: s32[16], index: 0, kind: input, shape index: {}]   ;;  %s1405_s1 = inlined_call_operand.vmem [shape: s32[16], index: 1, kind: input, shape index: {}]   ;;  %s1406_s2 = inlined_call_operand.vmem [shape: f32[8,128], index: 2, kind: input, shape index: {}]   ;;  %s1407_s3 = inlined_call_operand.vmem [shape: f32[16,128], index: 3, kind: input, shape index: {}]   ;;  %s1408_s4 = inlined_call_operand.vmem [shape: f32[8,1], index: 4, kind: input, shape index: {}]   ;;  %s1409_s5 = inlined_call_operand.vmem [shape: f32[128,128], index: 5, kind: input, shape index: {}]   ;;  %s1410_s6 = inlined_call_operand.vmem [shape: f32[128,128], index: 6, kind: input, shape index: {}]   ;;  %s1411_s7 = inlined_call_operand.vmem [shape: f32[1,128], index: 7, kind: input, shape index: {}]   ;;  %s1412_s8 = inlined_call_operand.vmem [shape: f32[128,128], index: 8, kind: input, shape index: {}]   ;;  %s1413_s9 = inlined_call_operand.vmem [shape: f32[128,128], index: 9, kind: input, shape index: {}]   ;;  %s1414_s10 = inlined_call_operand.vmem [shape: f32[1,128], index: 10, kind: input, shape index: {}]   ;;  %s1415_s11 = inlined_call_operand.hbm [shape: f32[8,128], index: 11, kind: output, shape index: {}]  }
   0x1   :  { %17 = vsyncpa [#allocation9], 0 }
   0x2   :  { %18 = vsyncpa [#allocation6], 0  ;;  %s25_s19 = sshll.u32 %s1404_s0, 4  ;;  %s35_s22 = sshll.u32 %s1405_s1, 4  ;;  %s26_s19 = int_to_ptr.vmem [resolvable:$true] %s25_s19  ;;  %s36_s22 = int_to_ptr.vmem [resolvable:$true] %s35_s22 }
   0x3   :  { %s1007_s23 = scalar_lea.vmem %s26_s19, 16  ;;  %p1012_p1 = scmp.lt.s32.totalorder %s26_s19, %s26_s19 }
   0x4   :  { %p1008_p0 = scmp.ne.s32.totalorder %s26_s19, %s1007_s23  ;;  %p1013_p2 = scmp.lt.s32.totalorder %s1007_s23, %s1007_s23 }
   0x6   :  { %p1014_p3 = por %p1013_p2, %p1012_p1 }
   0x8   :  { %p1015_p4 = pnand %p1014_p3, %p1008_p0 }
   0xa   :  { %1018 = shalt.err (!%p1015_p4)
}
   0xb   :  { %s1059_s24 = smov [#allocation5]   ;;  %s1019_s25 = scalar_lea.vmem %s36_s22, 16 }
   0xc   :  { %28 = dma.vmem_to_smem %s26_s19, 16, %s1059_s24, [#allocation7]  }
   0xd   :  { %p1020_p5 = scmp.ne.s32.totalorder %s36_s22, %s1019_s25  ;;  %p1024_p6 = scmp.lt.s32.totalorder %s36_s22, %s36_s22 }
   0xe   :  { %p1025_p7 = scmp.lt.s32.totalorder %s1019_s25, %s1019_s25 }
  0x10   :  { %p1026_p8 = por %p1025_p7, %p1024_p6 }
  0x12   :  { %p1027_p9 = pnand %p1026_p8, %p1020_p5 }
  0x14   :  { %1030 = shalt.err (!%p1027_p9)
}
  0x15   :  { %s1060_s0 = smov [#allocation8]  }
  0x16   :  { %38 = dma.vmem_to_smem %s36_s22, 16, %s1060_s0, [#allocation9]  }
  0x17   :  { %1053 = dma.done.wait [#allocation7], 16  }
  0x18   :  { %1054 = vsyncadd [#allocation7], 4294967280 }
  0x19   :  { %1055 = dma.done.wait [#allocation9], 16  }
  0x1a   :  { %1056 = vsyncadd [#allocation9], 4294967280 }
  0x1b   :  { %63 = sfence }
  0x1c   :  { %v154_v0 = vld [vmem:[%s1410_s6] sm:$0xff]  ;;  %v155_v1 = vld [vmem:[%s1410_s6 + $0x8] sm:$0xff]  ;;  %v1061_v4 = vmov 0.0|0.0   ;;  %v156_v6 = vld [vmem:[%s1410_s6 + $0x10] sm:$0xff]  ;;  %vm1062_vm0 = vmmov 0   ;;  %v1063_v8 = vmov 0.0  }
  0x1d   :  { %v65_v2 = vld [vmem:[%s1409_s5] sm:$0xff]  ;;  %v919_v3 = vpack.c.bf16 %v155_v1, %v154_v0  ;;  %895 = vmatprep.subr.bf16.mxu0 %v1061_v4  ;;  %v66_v5 = vld [vmem:[%s1409_s5 + $0x8] sm:$0xff]  ;;  %v157_v7 = vld [vmem:[%s1410_s6 + $0x18] sm:$0xff]  ;;  %787 = vmatprep.mubr.msk.f32.mxu0 %vm1062_vm0, %v1063_v8  ;;  %254 = vst [vmem:[#allocation4] sm:$0xff] %v1063_v8  ;;  %v1064_v53 = vmov 0   ;;  %s255_s13 = sld [smem:[#allocation5]] }
  0x1e   :  { %v896_v9 = vpack.c.bf16 %v66_v5, %v65_v2  ;;  %v923_v10 = vpack.c.bf16 %v157_v7, %v156_v6  ;;  %v67_v11 = vld [vmem:[%s1409_s5 + $0x10] sm:$0xff]  ;;  %v68_v12 = vld [vmem:[%s1409_s5 + $0x18] sm:$0xff]  ;;  %v158_v13 = vld [vmem:[%s1410_s6 + $0x20] sm:$0xff]  ;;  %1006 = vset.pattern.permute.xlu0 %v1064_v53  ;;  %s256_s14 = sld [smem:[#allocation8]]  ;;  %s655_s15 = sld [smem:[#allocation5 + $0x1]] }
  0x1f   :  { %920 = vmatprep.subr.bf16.mxu1 %v919_v3  ;;  %v159_v14 = vld [vmem:[%s1410_s6 + $0x28] sm:$0xff]  ;;  %v899_v15 = vpack.c.bf16 %v68_v12, %v67_v11  ;;  %v69_v17 = vld [vmem:[%s1409_s5 + $0x20] sm:$0xff]  ;;  %v160_v19 = vld [vmem:[%s1410_s6 + $0x30] sm:$0xff]  ;;  %s656_s17 = sld [smem:[#allocation8 + $0x1]]  ;;  %s1275_s1 = sld [smem:[#allocation8 + $0x2]] }
  0x20   :  { %922 = vmatpush3.bf16.msra.mxu1 %v919_v3  ;;  %897 = vmatpush3.bf16.msra.mxu0 %v896_v9  ;;  %v927_v16 = vpack.c.bf16 %v159_v14, %v158_v13  ;;  %v70_v18 = vld [vmem:[%s1409_s5 + $0x28] sm:$0xff]  ;;  %v161_v20 = vld [vmem:[%s1410_s6 + $0x38] sm:$0xff]  ;;  %v71_v23 = vld [vmem:[%s1409_s5 + $0x30] sm:$0xff]  ;;  %s1307_s20 = sld [smem:[#allocation8 + $0x3]]  ;;  %s668_s22 = sld [smem:[#allocation8 + $0x7]] }
  0x21   :  { %924 = vmatprep.subr.bf16.mxu1 %v923_v10  ;;  %898 = vmatprep.subr.bf16.mxu0 %v1061_v4  ;;  %v902_v21 = vpack.c.bf16 %v70_v18, %v69_v17  ;;  %v931_v22 = vpack.c.bf16 %v161_v20, %v160_v19  ;;  %v72_v24 = vld [vmem:[%s1409_s5 + $0x38] sm:$0xff]  ;;  %v162_v25 = vld [vmem:[%s1410_s6 + $0x40] sm:$0xff]  ;;  %v163_v26 = vld [vmem:[%s1410_s6 + $0x48] sm:$0xff]  ;;  %s669_s24 = sld [smem:[#allocation5 + $0x8]]  ;;  %s674_s30 = sld [smem:[#allocation8 + $0xa]] }
  0x22   :  { %v152_v27 = vld [vmem:[%s1407_s3] sm:$0xff]  ;;  %v905_v28 = vpack.c.bf16 %v72_v24, %v71_v23  ;;  %v935_v29 = vpack.c.bf16 %v163_v26, %v162_v25  ;;  %v74_v31 = vld [vmem:[%s1409_s5 + $0x48] sm:$0xff]  ;;  %v164_v32 = vld [vmem:[%s1410_s6 + $0x50] sm:$0xff]  ;;  %s670_s0 = sld [smem:[#allocation8 + $0x8]] }
  0x23   :  { %822 = vmatprep.mubr.f32.mxu1 %v152_v27  ;;  %v73_v30 = vld [vmem:[%s1409_s5 + $0x40] sm:$0xff]  ;;  %v165_v33 = vld [vmem:[%s1410_s6 + $0x58] sm:$0xff]  ;;  %v75_v36 = vld [vmem:[%s1409_s5 + $0x50] sm:$0xff]  ;;  %s257_s16 = scalar_lea.vmem [#allocation2], %s255_s13  ;;  %s1291_s13 = sld [smem:[#allocation5 + $0x3]] }
  0x24   :  { %926 = vmatpush3.bf16.msra.mxu1 %v923_v10  ;;  %900 = vmatpush3.bf16.msra.mxu0 %v899_v15  ;;  %v908_v34 = vpack.c.bf16 %v74_v31, %v73_v30  ;;  %v939_v35 = vpack.c.bf16 %v165_v33, %v164_v32  ;;  %v76_v37 = vld [vmem:[%s1409_s5 + $0x58] sm:$0xff]  ;;  %v166_v38 = vld [vmem:[%s1410_s6 + $0x60] sm:$0xff]  ;;  %v167_v39 = vld [vmem:[%s1410_s6 + $0x68] sm:$0xff]  ;;  %s267_s18 = scalar_lea.vmem [#allocation2], %s655_s15  ;;  %s677_s15 = sld [smem:[#allocation5 + $0xc]] }
  0x25   :  { %928 = vmatprep.subr.bf16.mxu1 %v927_v16  ;;  %901 = vmatprep.subr.bf16.mxu0 %v1061_v4  ;;  %v911_v40 = vpack.c.bf16 %v76_v37, %v75_v36  ;;  %v943_v41 = vpack.c.bf16 %v167_v39, %v166_v38  ;;  %v77_v42 = vld [vmem:[%s1409_s5 + $0x60] sm:$0xff]  ;;  %v78_v43 = vld [vmem:[%s1409_s5 + $0x68] sm:$0xff]  ;;  %v168_v44 = vld [vmem:[%s1410_s6 + $0x70] sm:$0xff]  ;;  %s271_s26 = scalar_lea.vmem [#allocation4], %s656_s17  ;;  %s281_s25 = scalar_lea.vmem [#allocation4], %s1275_s1 }
  0x26   :  { %v169_v45 = vld [vmem:[%s1410_s6 + $0x78] sm:$0xff]  ;;  %v914_v46 = vpack.c.bf16 %v78_v43, %v77_v42  ;;  %v79_v48 = vld [vmem:[%s1409_s5 + $0x70] sm:$0xff]  ;;  %v153_v51 = vld [vmem:[%s1407_s3 + $0x8] sm:$0xff]  ;;  %s1367_s1 = sld [smem:[#allocation8 + $0x4]]  ;;  %s291_s28 = scalar_lea.vmem [#allocation4], %s1307_s20 }
  0x27   :  { %v947_v47 = vpack.c.bf16 %v169_v45, %v168_v44  ;;  %v80_v49 = vld [vmem:[%s1409_s5 + $0x78] sm:$0xff]  ;;  %v1248_v52 = vld [vmem:[%s1406_s2] sm:$0xff]  ;;  %v425_v7 = vld [vmem:[%s1412_s8 + $0x8] sm:$0xff]  ;;  %s337_s27 = scalar_lea.vmem [#allocation2], %s669_s24  ;;  %s672_s6 = sld [smem:[#allocation8 + $0x9]] }
  0x28   :  { %930 = vmatpush3.bf16.msra.mxu1 %v927_v16  ;;  %903 = vmatpush3.bf16.msra.mxu0 %v902_v21  ;;  %v917_v50 = vpack.c.bf16 %v80_v49, %v79_v48  ;;  %v416_v54 = vld [vmem:[%s1408_s4] sm:$0xff]  ;;  %s261_s4 = scalar_lea.vmem [#allocation4], %s256_s14  ;;  %v441_v10 = vld [vmem:[%s1413_s9 + $0x8] sm:$0xff]  ;;  %v426_v15 = vld [vmem:[%s1412_s8 + $0x10] sm:$0xff]  ;;  %s1338_s14 = sld [smem:[#allocation5 + $0x4]] }
  0x29   :  { %932 = vmatprep.subr.bf16.mxu1 %v931_v22  ;;  %904 = vmatprep.subr.bf16.mxu0 %v1061_v4  ;;  %v654_v55 = vld [vmem:[%s1411_s7] ss:$0 sm:$0xff]  ;;  %s657_s7 = sld [smem:[#allocation5 + $0x2]]  ;;  %v427_v16 = vld [vmem:[%s1412_s8 + $0x18] sm:$0xff]  ;;  %v442_v18 = vld [vmem:[%s1413_s9 + $0x10] sm:$0xff]  ;;  %s287_s19 = scalar_lea.vmem [#allocation2], %s1291_s13 }
  0x2a   :  { %419 = vperm.xlu0 %1006, %v416_v54   ;;  %v262_v0 = vld [vmem:[%s261_s4] sm:$0x1]  ;;  %v979_v17 = vpack.c.bf16 %v427_v16, %v426_v15  ;;  %v443_v19 = vld [vmem:[%s1413_s9 + $0x18] sm:$0xff]  ;;  %v429_v23 = vld [vmem:[%s1412_s8 + $0x28] sm:$0xff]  ;;  %s331_s13 = scalar_lea.vmem [#allocation4], %s668_s22  ;;  %s675_s5 = sld [smem:[#allocation5 + $0xb]] }
  0x2b   :  { %v424_v6 = vld [vmem:[%s1412_s8] sm:$0xff]  ;;  %v955_v20 = vpack.c.bf16 %v443_v19, %v442_v18  ;;  %v445_v27 = vld [vmem:[%s1413_s9 + $0x28] sm:$0xff]  ;;  %v430_v30 = vld [vmem:[%s1412_s8 + $0x30] sm:$0xff]  ;;  %s676_s2 = sld [smem:[#allocation8 + $0xb]] }
  0x2c   :  { %934 = vmatpush3.bf16.msra.mxu1 %v931_v22  ;;  %906 = vmatpush3.bf16.msra.mxu0 %v905_v28  ;;  %v440_v9 = vld [vmem:[%s1413_s9] sm:$0xff]  ;;  %v431_v31 = vld [vmem:[%s1412_s8 + $0x38] sm:$0xff]  ;;  %v433_v39 = vld [vmem:[%s1412_s8 + $0x48] sm:$0xff]  ;;  %s301_s17 = scalar_lea.vmem [#allocation4], %s1367_s1  ;;  %s341_s1 = scalar_lea.vmem [#allocation4], %s670_s0 }
  0x2d   :  { %936 = vmatprep.subr.bf16.mxu1 %v935_v29  ;;  %907 = vmatprep.subr.bf16.mxu0 %v1061_v4  ;;  %v952_v12 = vpack.c.bf16 %v441_v10, %v440_v9  ;;  %v428_v22 = vld [vmem:[%s1412_s8 + $0x20] sm:$0xff]  ;;  %v985_v33 = vpack.c.bf16 %v431_v31, %v430_v30  ;;  %v449_v42 = vld [vmem:[%s1413_s9 + $0x48] sm:$0xff]  ;;  %v434_v44 = vld [vmem:[%s1412_s8 + $0x50] sm:$0xff]  ;;  %s351_s3 = scalar_lea.vmem [#allocation4], %s672_s6 }
  0x2e   :  { %v982_v25 = vpack.c.bf16 %v429_v23, %v428_v22  ;;  %v444_v26 = vld [vmem:[%s1413_s9 + $0x20] sm:$0xff]  ;;  %v435_v45 = vld [vmem:[%s1412_s8 + $0x58] sm:$0xff]  ;;  %v437_v54 = vld [vmem:[%s1412_s8 + $0x68] sm:$0xff] }
  0x2f   :  { %s277_s12 = scalar_lea.vmem [#allocation2], %s657_s7  ;;  %v958_v28 = vpack.c.bf16 %v445_v27, %v444_v26  ;;  %v432_v38 = vld [vmem:[%s1412_s8 + $0x40] sm:$0xff]  ;;  %v991_v49 = vpack.c.bf16 %v435_v45, %v434_v44 }
  0x30   :  { %938 = vmatpush3.bf16.msra.mxu1 %v935_v29  ;;  %909 = vmatpush3.bf16.msra.mxu0 %v908_v34  ;;  %v446_v34 = vld [vmem:[%s1413_s9 + $0x30] sm:$0xff]  ;;  %v436_v53 = vld [vmem:[%s1412_s8 + $0x60] sm:$0xff] }
  0x31   :  { %940 = vmatprep.subr.bf16.mxu1 %v939_v35  ;;  %910 = vmatprep.subr.bf16.mxu0 %v1061_v4 }
  0x34   :  { %942 = vmatpush3.bf16.msra.mxu1 %v939_v35  ;;  %912 = vmatpush3.bf16.msra.mxu0 %v911_v40  ;;  %v447_v35 = vld [vmem:[%s1413_s9 + $0x38] sm:$0xff]  ;;  %v988_v40 = vpack.c.bf16 %v433_v39, %v432_v38 }
  0x35   :  { %944 = vmatprep.subr.bf16.mxu1 %v943_v41  ;;  %913 = vmatprep.subr.bf16.mxu0 %v1061_v4  ;;  %v961_v37 = vpack.c.bf16 %v447_v35, %v446_v34 }
  0x38   :  { %946 = vmatpush3.bf16.msra.mxu1 %v943_v41  ;;  %915 = vmatpush3.bf16.msra.mxu0 %v914_v46  ;;  %v448_v41 = vld [vmem:[%s1413_s9 + $0x40] sm:$0xff]  ;;  %v450_v46 = vld [vmem:[%s1413_s9 + $0x50] sm:$0xff] }
  0x39   :  { %948 = vmatprep.subr.bf16.mxu1 %v947_v47  ;;  %916 = vmatprep.subr.bf16.mxu0 %v1061_v4  ;;  %v964_v43 = vpack.c.bf16 %v449_v42, %v448_v41 }
  0x3c   :  { %950 = vmatpush3.bf16.msra.mxu1 %v947_v47  ;;  %918 = vmatpush3.bf16.msra.mxu0 %v917_v50  ;;  %v451_v50 = vld [vmem:[%s1413_s9 + $0x58] sm:$0xff] }
  0x3d   :  { %975 = vmatprep.subr.bf16.mxu1 %v1061_v4  ;;  %951 = vmatprep.subr.bf16.mxu0 %v1061_v4 }
  0x3f   :  { %823 = vmatmul.mubr.f32.vlgmr.msra.gmra.mrb[0].mxu1 %v153_v51  ;;  %788 = vmatmul.mubr.f32.vlgmr.msra.gmra.mrb[0].mxu0 %v1248_v52  ;;  %v967_v51 = vpack.c.bf16 %v451_v50, %v450_v46 }
  0x40   :  { %892 = vmatprep.mubr.msk.f32.mxu1 %vm1062_vm0, %v1063_v8  ;;  %857 = vmatprep.mubr.msk.f32.mxu0 %vm1062_vm0, %v1063_v8  ;;  %v976_v8 = vpack.c.bf16 %v425_v7, %v424_v6 }
  0x41   :  { %953 = vmatpush3.bf16.msra.mxu0 %v952_v12 }
  0x42   :  { %977 = vmatpush3.bf16.msra.mxu1 %v976_v8  ;;  %954 = vmatprep.subr.bf16.mxu0 %v1061_v4 }
  0x43   :  { %978 = vmatprep.subr.bf16.mxu1 %v1061_v4 }
  0x45   :  { %956 = vmatpush3.bf16.msra.mxu0 %v955_v20 }
  0x46   :  { %980 = vmatpush3.bf16.msra.mxu1 %v979_v17  ;;  %957 = vmatprep.subr.bf16.mxu0 %v1061_v4 }
  0x47   :  { %981 = vmatprep.subr.bf16.mxu1 %v1061_v4 }
  0x49   :  { %959 = vmatpush3.bf16.msra.mxu0 %v958_v28 }
  0x4a   :  { %983 = vmatpush3.bf16.msra.mxu1 %v982_v25  ;;  %960 = vmatprep.subr.bf16.mxu0 %v1061_v4 }
  0x4b   :  { %984 = vmatprep.subr.bf16.mxu1 %v1061_v4 }
  0x4d   :  { %962 = vmatpush3.bf16.msra.mxu0 %v961_v37 }
  0x4e   :  { %986 = vmatpush3.bf16.msra.mxu1 %v985_v33  ;;  %963 = vmatprep.subr.bf16.mxu0 %v1061_v4 }
  0x4f   :  { %987 = vmatprep.subr.bf16.mxu1 %v1061_v4 }
  0x51   :  { %965 = vmatpush3.bf16.msra.mxu0 %v964_v43 }
  0x52   :  { %989 = vmatpush3.bf16.msra.mxu1 %v988_v40  ;;  %966 = vmatprep.subr.bf16.mxu0 %v1061_v4 }
  0x53   :  { %990 = vmatprep.subr.bf16.mxu1 %v1061_v4 }
  0x55   :  { %968 = vmatpush3.bf16.msra.mxu0 %v967_v51 }
  0x56   :  { %992 = vmatpush3.bf16.msra.mxu1 %v991_v49  ;;  %969 = vmatprep.subr.bf16.mxu0 %v1061_v4 }
  0x57   :  { %993 = vmatprep.subr.bf16.mxu1 %v1061_v4 }
 0x112   :  { %v824_v56 = vpop.f32.mrb[0].mxu1  ;;  %v147_v57 = vpop.f32.mrb[0].mxu0 }
 0x113   :  { %v249_v58 = vadd.f32 %v824_v56, %v654_v55  ;;  %v243_v59 = vpop.f32.mrb[1].mxu1  ;;  %151 = vst [vmem:[#allocation2] sm:$0xff] %v147_v57  ;;  %v789_v60 = vpop.f32.mrb[1].mxu0  ;;  %v453_v56 = vld [vmem:[%s1413_s9 + $0x68] sm:$0xff] }
 0x114   :  { %v244_v61 = vadd.f32 %v654_v55, %v243_v59  ;;  %v452_v55 = vld [vmem:[%s1413_s9 + $0x60] sm:$0xff]  ;;  %v994_v59 = vpack.c.bf16 %v437_v54, %v436_v53 }
 0x115   :  { %253 = vst [vmem:[#allocation3 + $0x8] sm:$0xff] %v249_v58 }
 0x116   :  { %252 = vst [vmem:[#allocation3] sm:$0xff] %v244_v61  ;;  %v970_v61 = vpack.c.bf16 %v453_v56, %v452_v55  ;;  %995 = vmatpush3.bf16.msra.mxu1 %v994_v59 }
 0x117   :  { %996 = vmatprep.subr.bf16.mxu1 %v1061_v4 }
 0x118   :  { %971 = vmatpush3.bf16.msra.mxu0 %v970_v61 }
 0x119   :  { %972 = vmatprep.subr.bf16.mxu0 %v1061_v4 }
 0x11a   :  { %v258_v62 = vld [vmem:[%s257_s16] sm:$0x1]  ;;  %s663_s16 = sld [smem:[#allocation5 + $0x5]] }
 0x11b   :  { %v268_v5 = vld [vmem:[%s267_s18] sm:$0x1]  ;;  %s666_s18 = sld [smem:[#allocation8 + $0x6]] }
 0x11c   :  { %v278_v21 = vld [vmem:[%s277_s12] sm:$0x1]  ;;  %v339_v23 = vld [vmem:[#allocation3 + $0x8] sm:$0x1]  ;;  %v349_v28 = vld [vmem:[#allocation3 + $0x9] sm:$0x1] }
 0x11d   :  { %v259_v63 = vld [vmem:[#allocation3] sm:$0x1]  ;;  %v269_v3 = vld [vmem:[#allocation3 + $0x1] sm:$0x1]  ;;  %v279_v24 = vld [vmem:[#allocation3 + $0x2] sm:$0x1] }
 0x11e   :  { %v260_v1 = vadd.f32 %v259_v63, %v258_v62  ;;  %v270_v11 = vadd.f32 %v269_v3, %v268_v5  ;;  %v280_v29 = vadd.f32 %v279_v24, %v278_v21  ;;  %v289_v47 = vld [vmem:[#allocation3 + $0x3] sm:$0x1]  ;;  %v288_v48 = vld [vmem:[%s287_s19] sm:$0x1]  ;;  %v438_v62 = vld [vmem:[%s1412_s8 + $0x70] sm:$0xff]  ;;  %s667_s19 = sld [smem:[#allocation5 + $0x7]] }
 0x11f   :  { %v290_v57 = vadd.f32 %v289_v47, %v288_v48  ;;  %v439_v63 = vld [vmem:[%s1412_s8 + $0x78] sm:$0xff]  ;;  %v299_v5 = vld [vmem:[#allocation3 + $0x4] sm:$0x1]  ;;  %s297_s8 = scalar_lea.vmem [#allocation2], %s1338_s14  ;;  %v309_v10 = vld [vmem:[#allocation3 + $0x5] sm:$0x1] }
 0x120   :  { %v263_v2 = vadd.f32 %v262_v0, %v260_v1  ;;  %v454_v0 = vld [vmem:[%s1413_s9 + $0x70] sm:$0xff]  ;;  %v455_v1 = vld [vmem:[%s1413_s9 + $0x78] sm:$0xff]  ;;  %v298_v6 = vld [vmem:[%s297_s8] sm:$0x1]  ;;  %s665_s9 = sld [smem:[#allocation5 + $0x6]]  ;;  %s307_s7 = scalar_lea.vmem [#allocation2], %s663_s16 }
 0x121   :  { %v973_v3 = vpack.c.bf16 %v455_v1, %v454_v0  ;;  %v300_v7 = vadd.f32 %v299_v5, %v298_v6  ;;  %v319_v4 = vld [vmem:[#allocation3 + $0x6] sm:$0x1]  ;;  %s321_s23 = scalar_lea.vmem [#allocation4], %s666_s18  ;;  %v329_v18 = vld [vmem:[#allocation3 + $0x7] sm:$0x1]  ;;  %s361_s12 = scalar_lea.vmem [#allocation4], %s674_s30  ;;  %v420_v0 = vpop.permute.xlu0 %419 }
 0x122   :  { %264 = vst [vmem:[%s261_s4] sm:$0x1] %v263_v2  ;;  %v997_v2 = vpack.c.bf16 %v439_v63, %v438_v62  ;;  %s664_s4 = sld [smem:[#allocation8 + $0x5]]  ;;  %v338_v24 = vld [vmem:[%s337_s27] sm:$0x1]  ;;  %v359_v33 = vld [vmem:[#allocation3 + $0xa] sm:$0x1] }
 0x123   :  { %974 = vmatpush3.bf16.msra.mxu0 %v973_v3  ;;  %v340_v25 = vadd.f32 %v339_v23, %v338_v24  ;;  %v369_v38 = vld [vmem:[#allocation3 + $0xb] sm:$0x1]  ;;  %s367_s16 = scalar_lea.vmem [#allocation2], %s675_s5  ;;  %s678_s8 = sld [smem:[#allocation8 + $0xc]]  ;;  %v379_v43 = vld [vmem:[#allocation3 + $0xc] sm:$0x1] }
 0x124   :  { %998 = vmatpush3.bf16.msra.mxu1 %v997_v2  ;;  %v368_v39 = vld [vmem:[%s367_s16] sm:$0x1]  ;;  %v389_v48 = vld [vmem:[#allocation3 + $0xd] sm:$0x1]  ;;  %v399_v54 = vld [vmem:[#allocation3 + $0xe] sm:$0x1] }
 0x125   :  { %v370_v40 = vadd.f32 %v369_v38, %v368_v39  ;;  %v409_v59 = vld [vmem:[#allocation3 + $0xf] sm:$0x1] }
 0x126   :  { %s317_s21 = scalar_lea.vmem [#allocation2], %s665_s9  ;;  %s377_s9 = scalar_lea.vmem [#allocation2], %s677_s15 }
 0x127   :  { %893 = vmatmul.mubr.f32.vlgmr.msra.gmra.mrb[2].mxu1 %v1248_v52  ;;  %v318_v15 = vld [vmem:[%s317_s21] sm:$0x1]  ;;  %s682_s21 = sld [smem:[#allocation8 + $0xe]] }
 0x128   :  { %s311_s14 = scalar_lea.vmem [#allocation4], %s664_s4  ;;  %v320_v16 = vadd.f32 %v319_v4, %v318_v15  ;;  %s371_s4 = scalar_lea.vmem [#allocation4], %s676_s2  ;;  %v378_v44 = vld [vmem:[%s377_s9] sm:$0x1] }
 0x129   :  { %v272_v13 = vld [vmem:[%s271_s26] sm:$0x1]  ;;  %v380_v45 = vadd.f32 %v379_v43, %v378_v44  ;;  %s381_s18 = scalar_lea.vmem [#allocation4], %s678_s8 }
 0x12a   :  { %v273_v14 = vadd.f32 %v272_v13, %v270_v11  ;;  %v308_v11 = vld [vmem:[%s307_s7] sm:$0x1]  ;;  %s680_s7 = sld [smem:[#allocation8 + $0xd]] }
 0x12b   :  { %v310_v12 = vadd.f32 %v309_v10, %v308_v11 }
 0x12c   :  { %274 = vst [vmem:[%s271_s26] sm:$0x1] %v273_v14  ;;  %s671_s26 = sld [smem:[#allocation5 + $0x9]] }
 0x12d   :  { %s401_s0 = scalar_lea.vmem [#allocation4], %s682_s21 }
 0x130   :  { %s391_s22 = scalar_lea.vmem [#allocation4], %s680_s7 }
 0x132   :  { %s347_s29 = scalar_lea.vmem [#allocation2], %s671_s26 }
 0x133   :  { %v282_v32 = vld [vmem:[%s281_s25] sm:$0x1] }
 0x134   :  { %v283_v36 = vadd.f32 %v282_v32, %v280_v29  ;;  %v348_v29 = vld [vmem:[%s347_s29] sm:$0x1] }
 0x135   :  { %v350_v30 = vadd.f32 %v349_v28, %v348_v29 }
 0x136   :  { %284 = vst [vmem:[%s281_s25] sm:$0x1] %v283_v36  ;;  %s327_s25 = scalar_lea.vmem [#allocation2], %s667_s19 }
 0x137   :  { %v328_v19 = vld [vmem:[%s327_s25] sm:$0x1]  ;;  %s684_s25 = sld [smem:[#allocation8 + $0xf]] }
 0x138   :  { %v330_v20 = vadd.f32 %v329_v18, %v328_v19 }
 0x13d   :  { %v292_v58 = vld [vmem:[%s291_s28] sm:$0x1]  ;;  %s411_s26 = scalar_lea.vmem [#allocation4], %s684_s25 }
 0x13e   :  { %v293_v60 = vadd.f32 %v292_v58, %v290_v57 }
 0x140   :  { %294 = vst [vmem:[%s291_s28] sm:$0x1] %v293_v60  ;;  %s673_s28 = sld [smem:[#allocation5 + $0xa]] }
 0x146   :  { %s357_s20 = scalar_lea.vmem [#allocation2], %s673_s28 }
 0x147   :  { %v302_v8 = vld [vmem:[%s301_s17] sm:$0x1] }
 0x148   :  { %v303_v9 = vadd.f32 %v302_v8, %v300_v7  ;;  %v358_v34 = vld [vmem:[%s357_s20] sm:$0x1] }
 0x149   :  { %v360_v35 = vadd.f32 %v359_v33, %v358_v34  ;;  %v685_v7 = vld [vmem:[%s1414_s10] ss:$0 sm:$0xff] }
 0x14a   :  { %304 = vst [vmem:[%s301_s17] sm:$0x1] %v303_v9  ;;  %s679_s17 = sld [smem:[#allocation5 + $0xd]] }
 0x150   :  { %s387_s19 = scalar_lea.vmem [#allocation2], %s679_s17 }
 0x151   :  { %v312_v13 = vld [vmem:[%s311_s14] sm:$0x1] }
 0x152   :  { %v313_v14 = vadd.f32 %v312_v13, %v310_v12  ;;  %v388_v49 = vld [vmem:[%s387_s19] sm:$0x1] }
 0x153   :  { %v390_v50 = vadd.f32 %v389_v48, %v388_v49 }
 0x154   :  { %314 = vst [vmem:[%s311_s14] sm:$0x1] %v313_v14  ;;  %s681_s14 = sld [smem:[#allocation5 + $0xe]] }
 0x15a   :  { %s397_s24 = scalar_lea.vmem [#allocation2], %s681_s14 }
 0x15b   :  { %v322_v17 = vld [vmem:[%s321_s23] sm:$0x1] }
 0x15c   :  { %v323_v52 = vadd.f32 %v322_v17, %v320_v16  ;;  %v398_v55 = vld [vmem:[%s397_s24] sm:$0x1] }
 0x15d   :  { %v400_v56 = vadd.f32 %v399_v54, %v398_v55 }
 0x15e   :  { %324 = vst [vmem:[%s321_s23] sm:$0x1] %v323_v52  ;;  %s683_s23 = sld [smem:[#allocation5 + $0xf]] }
 0x165   :  { %v332_v21 = vld [vmem:[%s331_s13] sm:$0x1] }
 0x166   :  { %v333_v22 = vadd.f32 %v332_v21, %v330_v20 }
 0x168   :  { %334 = vst [vmem:[%s331_s13] sm:$0x1] %v333_v22  ;;  %s407_s13 = scalar_lea.vmem [#allocation2], %s683_s23 }
 0x169   :  { %v408_v60 = vld [vmem:[%s407_s13] sm:$0x1] }
 0x16a   :  { %v410_v61 = vadd.f32 %v409_v59, %v408_v60 }
 0x16f   :  { %v342_v26 = vld [vmem:[%s341_s1] sm:$0x1] }
 0x170   :  { %v343_v27 = vadd.f32 %v342_v26, %v340_v25 }
 0x172   :  { %344 = vst [vmem:[%s341_s1] sm:$0x1] %v343_v27  ;;  %s1065_s1 = smov [#allocation10]  }
 0x173   :  { %s612_s28 = sshll.u32 %s1065_s1, 4  ;;  %s613_s28 = int_to_ptr.vmem [resolvable:$true] %s612_s28 }
 0x174   :  { %s1031_s29 = scalar_lea.vmem %s613_s28, 128  ;;  %p1036_p11 = scmp.lt.s32.totalorder %s613_s28, %s613_s28 }
 0x175   :  { %p1032_p10 = scmp.ne.s32.totalorder %s613_s28, %s1031_s29  ;;  %p1037_p12 = scmp.lt.s32.totalorder %s1031_s29, %s1031_s29 }
 0x177   :  { %p1038_p13 = por %p1037_p12, %p1036_p11 }
 0x179   :  { %v352_v31 = vld [vmem:[%s351_s3] sm:$0x1]  ;;  %p1039_p0 = pnand %p1038_p13, %p1032_p10 }
 0x17a   :  { %v353_v32 = vadd.f32 %v352_v31, %v350_v30 }
 0x17c   :  { %354 = vst [vmem:[%s351_s3] sm:$0x1] %v353_v32 }
 0x183   :  { %v362_v36 = vld [vmem:[%s361_s12] sm:$0x1] }
 0x184   :  { %v363_v37 = vadd.f32 %v362_v36, %v360_v35 }
 0x186   :  { %364 = vst [vmem:[%s361_s12] sm:$0x1] %v363_v37 }
 0x18d   :  { %v372_v41 = vld [vmem:[%s371_s4] sm:$0x1] }
 0x18e   :  { %v373_v42 = vadd.f32 %v372_v41, %v370_v40 }
 0x190   :  { %374 = vst [vmem:[%s371_s4] sm:$0x1] %v373_v42 }
 0x197   :  { %v382_v46 = vld [vmem:[%s381_s18] sm:$0x1] }
 0x198   :  { %v383_v47 = vadd.f32 %v382_v46, %v380_v45 }
 0x19a   :  { %384 = vst [vmem:[%s381_s18] sm:$0x1] %v383_v47 }
 0x1a1   :  { %v392_v51 = vld [vmem:[%s391_s22] sm:$0x1] }
 0x1a2   :  { %v393_v53 = vadd.f32 %v392_v51, %v390_v50 }
 0x1a4   :  { %394 = vst [vmem:[%s391_s22] sm:$0x1] %v393_v53 }
 0x1ab   :  { %v402_v57 = vld [vmem:[%s401_s0] sm:$0x1] }
 0x1ac   :  { %v403_v58 = vadd.f32 %v402_v57, %v400_v56 }
 0x1ae   :  { %404 = vst [vmem:[%s401_s0] sm:$0x1] %v403_v58 }
 0x1b5   :  { %v412_v62 = vld [vmem:[%s411_s26] sm:$0x1] }
 0x1b6   :  { %v413_v63 = vadd.f32 %v412_v62, %v410_v61 }
 0x1b8   :  { %414 = vst [vmem:[%s411_s26] sm:$0x1] %v413_v63 }
 0x1bf   :  { %v415_v1 = vld [vmem:[#allocation4] sm:$0xff] }
 0x1c0   :  { %v422_v2 = vmul.f32 %v420_v0, %v415_v1 }
 0x1c2   :  { %858 = vmatmul.mubr.f32.vlgmr.msra.gmra.mrb[2].mxu0 %v422_v2 }
 0x1fa   :  { %v592_v3 = vpop.f32.mrb[2].mxu1 }
 0x1fb   :  { %v894_v5 = vpop.f32.mrb[3].mxu1 }
 0x295   :  { %v522_v6 = vpop.f32.mrb[2].mxu0 }
 0x296   :  { %v593_v8 = vadd.f32 %v592_v3, %v522_v6  ;;  %v859_v9 = vpop.f32.mrb[3].mxu0 }
 0x298   :  { %v603_v10 = vadd.f32 %v685_v7, %v593_v8 }
 0x29a   :  { %v604_v11 = vmax.f32 %v603_v10, 0.0 }
 0x29c   :  { %605 = vst [vmem:[#allocation10] sm:$0xff] %v604_v11 }
 0x29d   :  { %1042 = shalt.err (!%p1039_p0)
}
 0x29e   :  { %s1043_s5 = scalar_lea.hbm %s1415_s11, 128 }
 0x29f   :  { %p1044_p1 = scmp.ne.s32.totalorder %s1415_s11, %s1043_s5  ;;  %p1047_p2 = scmp.lt.u32.totalorder %s1043_s5, %s1415_s11 }
 0x2a1   :  { %p1049_p3 = pnand %p1047_p2, %p1044_p1 }
 0x2a3   :  { %1052 = shalt.err (!%p1049_p3)
}
 0x2a4   :  { %615 = dma.vmem_to_hbm [thread:$0]  %s613_s28, 128, %s1415_s11, [#allocation6]  }
 0x2a5   :  { %1057 = dma.done.wait [#allocation6], 128  }
 0x2a6   :  { %1058 = vsyncadd [#allocation6], 4294967168 }
 0x2a7   :  { %619 = vsyncpa [#allocation6], 1 }
 0x2a8   :  { %620 = vsyncpa [#allocation7], 1 }
 0x2a9   :  { %621 = vsyncpa [#allocation9], 1 }

// kernel: sage_forward.3
= control target key start
LH: loop header
LB: loop body
LE: loop exit
PB: predicated region body
PF: predicated region fallthrough
CT: control target
= control target key end

     0   :  { %16 = vsyncpa [#allocation6], 0  ;;  %s1358_s0 = inlined_call_operand.vmem [shape: s32[16], index: 0, kind: input, shape index: {}]   ;;  %s1359_s1 = inlined_call_operand.vmem [shape: s32[16], index: 1, kind: input, shape index: {}]   ;;  %s1360_s2 = inlined_call_operand.vmem [shape: f32[8,128], index: 2, kind: input, shape index: {}]   ;;  %s1361_s3 = inlined_call_operand.vmem [shape: f32[16,128], index: 3, kind: input, shape index: {}]   ;;  %s1362_s4 = inlined_call_operand.vmem [shape: f32[8,1], index: 4, kind: input, shape index: {}]   ;;  %s1363_s5 = inlined_call_operand.vmem [shape: f32[128,128], index: 5, kind: input, shape index: {}]   ;;  %s1364_s6 = inlined_call_operand.vmem [shape: f32[128,128], index: 6, kind: input, shape index: {}]   ;;  %s1365_s7 = inlined_call_operand.vmem [shape: f32[1,128], index: 7, kind: input, shape index: {}]   ;;  %s1366_s8 = inlined_call_operand.vmem [shape: f32[128,128], index: 8, kind: input, shape index: {}]   ;;  %s1367_s9 = inlined_call_operand.vmem [shape: f32[128,128], index: 9, kind: input, shape index: {}]   ;;  %s1368_s10 = inlined_call_operand.vmem [shape: f32[1,128], index: 10, kind: input, shape index: {}]   ;;  %s1369_s11 = inlined_call_operand.vmem [shape: f32[8,128], index: 11, kind: output, shape index: {}]  }
   0x1   :  { %s24_s19 = sshll.u32 %s1358_s0, 4  ;;  %s25_s19 = int_to_ptr.vmem [resolvable:$true] %s24_s19 }
   0x2   :  { %17 = vsyncpa [#allocation8], 0  ;;  %s34_s22 = sshll.u32 %s1359_s1, 4  ;;  %s995_s23 = scalar_lea.vmem %s25_s19, 16  ;;  %s35_s22 = int_to_ptr.vmem [resolvable:$true] %s34_s22 }
   0x3   :  { %p996_p0 = scmp.ne.s32.totalorder %s25_s19, %s995_s23  ;;  %p1000_p1 = scmp.lt.s32.totalorder %s25_s19, %s25_s19 }
   0x4   :  { %p1001_p2 = scmp.lt.s32.totalorder %s995_s23, %s995_s23 }
   0x6   :  { %p1002_p3 = por %p1001_p2, %p1000_p1 }
   0x8   :  { %p1003_p4 = pnand %p1002_p3, %p996_p0 }
   0xa   :  { %1006 = shalt.err (!%p1003_p4)
}
   0xb   :  { %s1023_s24 = smov [#allocation5]   ;;  %s1007_s25 = scalar_lea.vmem %s35_s22, 16 }
   0xc   :  { %27 = dma.vmem_to_smem %s25_s19, 16, %s1023_s24, [#allocation6]  }
   0xd   :  { %p1008_p5 = scmp.ne.s32.totalorder %s35_s22, %s1007_s25  ;;  %p1012_p6 = scmp.lt.s32.totalorder %s35_s22, %s35_s22 }
   0xe   :  { %p1013_p7 = scmp.lt.s32.totalorder %s1007_s25, %s1007_s25 }
  0x10   :  { %p1014_p8 = por %p1013_p7, %p1012_p6 }
  0x12   :  { %p1015_p9 = pnand %p1014_p8, %p1008_p5 }
  0x14   :  { %1018 = shalt.err (!%p1015_p9)
}
  0x15   :  { %s1024_s0 = smov [#allocation7]  }
  0x16   :  { %37 = dma.vmem_to_smem %s35_s22, 16, %s1024_s0, [#allocation8]  }
  0x17   :  { %1019 = dma.done.wait [#allocation6], 16  }
  0x18   :  { %1020 = vsyncadd [#allocation6], 4294967280 }
  0x19   :  { %1021 = dma.done.wait [#allocation8], 16  }
  0x1a   :  { %1022 = vsyncadd [#allocation8], 4294967280 }
  0x1b   :  { %62 = sfence }
  0x1c   :  { %v153_v0 = vld [vmem:[%s1364_s6] sm:$0xff]  ;;  %v154_v1 = vld [vmem:[%s1364_s6 + $0x8] sm:$0xff]  ;;  %v1025_v4 = vmov 0.0|0.0   ;;  %v155_v6 = vld [vmem:[%s1364_s6 + $0x10] sm:$0xff]  ;;  %vm1026_vm0 = vmmov 0   ;;  %v1027_v8 = vmov 0.0  }
  0x1d   :  { %v64_v2 = vld [vmem:[%s1363_s5] sm:$0xff]  ;;  %v908_v3 = vpack.c.bf16 %v154_v1, %v153_v0  ;;  %884 = vmatprep.subr.bf16.mxu0 %v1025_v4  ;;  %v65_v5 = vld [vmem:[%s1363_s5 + $0x8] sm:$0xff]  ;;  %v156_v7 = vld [vmem:[%s1364_s6 + $0x18] sm:$0xff]  ;;  %776 = vmatprep.mubr.msk.f32.mxu0 %vm1026_vm0, %v1027_v8  ;;  %253 = vst [vmem:[#allocation4] sm:$0xff] %v1027_v8  ;;  %v1028_v53 = vmov 0   ;;  %s254_s13 = sld [smem:[#allocation5]] }
  0x1e   :  { %v885_v9 = vpack.c.bf16 %v65_v5, %v64_v2  ;;  %v912_v10 = vpack.c.bf16 %v156_v7, %v155_v6  ;;  %v66_v11 = vld [vmem:[%s1363_s5 + $0x10] sm:$0xff]  ;;  %v67_v12 = vld [vmem:[%s1363_s5 + $0x18] sm:$0xff]  ;;  %v157_v13 = vld [vmem:[%s1364_s6 + $0x20] sm:$0xff]  ;;  %994 = vset.pattern.permute.xlu0 %v1028_v53  ;;  %s255_s14 = sld [smem:[#allocation7]]  ;;  %s644_s15 = sld [smem:[#allocation5 + $0x1]] }
  0x1f   :  { %909 = vmatprep.subr.bf16.mxu1 %v908_v3  ;;  %v158_v14 = vld [vmem:[%s1364_s6 + $0x28] sm:$0xff]  ;;  %v888_v15 = vpack.c.bf16 %v67_v12, %v66_v11  ;;  %v68_v17 = vld [vmem:[%s1363_s5 + $0x20] sm:$0xff]  ;;  %v159_v19 = vld [vmem:[%s1364_s6 + $0x30] sm:$0xff]  ;;  %s645_s17 = sld [smem:[#allocation7 + $0x1]]  ;;  %s1238_s1 = sld [smem:[#allocation7 + $0x2]] }
  0x20   :  { %911 = vmatpush3.bf16.msra.mxu1 %v908_v3  ;;  %886 = vmatpush3.bf16.msra.mxu0 %v885_v9  ;;  %v916_v16 = vpack.c.bf16 %v158_v14, %v157_v13  ;;  %v69_v18 = vld [vmem:[%s1363_s5 + $0x28] sm:$0xff]  ;;  %v160_v20 = vld [vmem:[%s1364_s6 + $0x38] sm:$0xff]  ;;  %v70_v23 = vld [vmem:[%s1363_s5 + $0x30] sm:$0xff]  ;;  %s1270_s20 = sld [smem:[#allocation7 + $0x3]]  ;;  %s657_s22 = sld [smem:[#allocation7 + $0x7]] }
  0x21   :  { %913 = vmatprep.subr.bf16.mxu1 %v912_v10  ;;  %887 = vmatprep.subr.bf16.mxu0 %v1025_v4  ;;  %v891_v21 = vpack.c.bf16 %v69_v18, %v68_v17  ;;  %v920_v22 = vpack.c.bf16 %v160_v20, %v159_v19  ;;  %v71_v24 = vld [vmem:[%s1363_s5 + $0x38] sm:$0xff]  ;;  %v161_v25 = vld [vmem:[%s1364_s6 + $0x40] sm:$0xff]  ;;  %v162_v26 = vld [vmem:[%s1364_s6 + $0x48] sm:$0xff]  ;;  %s658_s24 = sld [smem:[#allocation5 + $0x8]]  ;;  %s663_s30 = sld [smem:[#allocation7 + $0xa]] }
  0x22   :  { %v151_v27 = vld [vmem:[%s1361_s3] sm:$0xff]  ;;  %v894_v28 = vpack.c.bf16 %v71_v24, %v70_v23  ;;  %v924_v29 = vpack.c.bf16 %v162_v26, %v161_v25  ;;  %v73_v31 = vld [vmem:[%s1363_s5 + $0x48] sm:$0xff]  ;;  %v163_v32 = vld [vmem:[%s1364_s6 + $0x50] sm:$0xff]  ;;  %s659_s0 = sld [smem:[#allocation7 + $0x8]] }
  0x23   :  { %811 = vmatprep.mubr.f32.mxu1 %v151_v27  ;;  %v72_v30 = vld [vmem:[%s1363_s5 + $0x40] sm:$0xff]  ;;  %v164_v33 = vld [vmem:[%s1364_s6 + $0x58] sm:$0xff]  ;;  %v74_v36 = vld [vmem:[%s1363_s5 + $0x50] sm:$0xff]  ;;  %s256_s16 = scalar_lea.vmem [#allocation2], %s254_s13  ;;  %s1254_s13 = sld [smem:[#allocation5 + $0x3]] }
  0x24   :  { %915 = vmatpush3.bf16.msra.mxu1 %v912_v10  ;;  %889 = vmatpush3.bf16.msra.mxu0 %v888_v15  ;;  %v897_v34 = vpack.c.bf16 %v73_v31, %v72_v30  ;;  %v928_v35 = vpack.c.bf16 %v164_v33, %v163_v32  ;;  %v75_v37 = vld [vmem:[%s1363_s5 + $0x58] sm:$0xff]  ;;  %v165_v38 = vld [vmem:[%s1364_s6 + $0x60] sm:$0xff]  ;;  %v166_v39 = vld [vmem:[%s1364_s6 + $0x68] sm:$0xff]  ;;  %s266_s18 = scalar_lea.vmem [#allocation2], %s644_s15  ;;  %s666_s15 = sld [smem:[#allocation5 + $0xc]] }
  0x25   :  { %917 = vmatprep.subr.bf16.mxu1 %v916_v16  ;;  %890 = vmatprep.subr.bf16.mxu0 %v1025_v4  ;;  %v900_v40 = vpack.c.bf16 %v75_v37, %v74_v36  ;;  %v932_v41 = vpack.c.bf16 %v166_v39, %v165_v38  ;;  %v76_v42 = vld [vmem:[%s1363_s5 + $0x60] sm:$0xff]  ;;  %v77_v43 = vld [vmem:[%s1363_s5 + $0x68] sm:$0xff]  ;;  %v167_v44 = vld [vmem:[%s1364_s6 + $0x70] sm:$0xff]  ;;  %s270_s26 = scalar_lea.vmem [#allocation4], %s645_s17  ;;  %s280_s25 = scalar_lea.vmem [#allocation4], %s1238_s1 }
  0x26   :  { %v168_v45 = vld [vmem:[%s1364_s6 + $0x78] sm:$0xff]  ;;  %v903_v46 = vpack.c.bf16 %v77_v43, %v76_v42  ;;  %v78_v48 = vld [vmem:[%s1363_s5 + $0x70] sm:$0xff]  ;;  %v152_v51 = vld [vmem:[%s1361_s3 + $0x8] sm:$0xff]  ;;  %s1330_s1 = sld [smem:[#allocation7 + $0x4]]  ;;  %s290_s28 = scalar_lea.vmem [#allocation4], %s1270_s20 }
  0x27   :  { %v936_v47 = vpack.c.bf16 %v168_v45, %v167_v44  ;;  %v79_v49 = vld [vmem:[%s1363_s5 + $0x78] sm:$0xff]  ;;  %v1211_v52 = vld [vmem:[%s1360_s2] sm:$0xff]  ;;  %v424_v7 = vld [vmem:[%s1366_s8 + $0x8] sm:$0xff]  ;;  %s336_s27 = scalar_lea.vmem [#allocation2], %s658_s24  ;;  %s661_s6 = sld [smem:[#allocation7 + $0x9]] }
  0x28   :  { %919 = vmatpush3.bf16.msra.mxu1 %v916_v16  ;;  %892 = vmatpush3.bf16.msra.mxu0 %v891_v21  ;;  %v906_v50 = vpack.c.bf16 %v79_v49, %v78_v48  ;;  %v415_v54 = vld [vmem:[%s1362_s4] sm:$0xff]  ;;  %s260_s4 = scalar_lea.vmem [#allocation4], %s255_s14  ;;  %v440_v10 = vld [vmem:[%s1367_s9 + $0x8] sm:$0xff]  ;;  %v425_v15 = vld [vmem:[%s1366_s8 + $0x10] sm:$0xff]  ;;  %s1301_s14 = sld [smem:[#allocation5 + $0x4]] }
  0x29   :  { %921 = vmatprep.subr.bf16.mxu1 %v920_v22  ;;  %893 = vmatprep.subr.bf16.mxu0 %v1025_v4  ;;  %v643_v55 = vld [vmem:[%s1365_s7] ss:$0 sm:$0xff]  ;;  %s646_s7 = sld [smem:[#allocation5 + $0x2]]  ;;  %v426_v16 = vld [vmem:[%s1366_s8 + $0x18] sm:$0xff]  ;;  %v441_v18 = vld [vmem:[%s1367_s9 + $0x10] sm:$0xff]  ;;  %s286_s19 = scalar_lea.vmem [#allocation2], %s1254_s13 }
  0x2a   :  { %418 = vperm.xlu0 %994, %v415_v54   ;;  %v261_v0 = vld [vmem:[%s260_s4] sm:$0x1]  ;;  %v968_v17 = vpack.c.bf16 %v426_v16, %v425_v15  ;;  %v442_v19 = vld [vmem:[%s1367_s9 + $0x18] sm:$0xff]  ;;  %v428_v23 = vld [vmem:[%s1366_s8 + $0x28] sm:$0xff]  ;;  %s330_s13 = scalar_lea.vmem [#allocation4], %s657_s22  ;;  %s664_s5 = sld [smem:[#allocation5 + $0xb]] }
  0x2b   :  { %v423_v6 = vld [vmem:[%s1366_s8] sm:$0xff]  ;;  %v944_v20 = vpack.c.bf16 %v442_v19, %v441_v18  ;;  %v444_v27 = vld [vmem:[%s1367_s9 + $0x28] sm:$0xff]  ;;  %v429_v30 = vld [vmem:[%s1366_s8 + $0x30] sm:$0xff]  ;;  %s665_s2 = sld [smem:[#allocation7 + $0xb]] }
  0x2c   :  { %923 = vmatpush3.bf16.msra.mxu1 %v920_v22  ;;  %895 = vmatpush3.bf16.msra.mxu0 %v894_v28  ;;  %v439_v9 = vld [vmem:[%s1367_s9] sm:$0xff]  ;;  %v430_v31 = vld [vmem:[%s1366_s8 + $0x38] sm:$0xff]  ;;  %v432_v39 = vld [vmem:[%s1366_s8 + $0x48] sm:$0xff]  ;;  %s300_s17 = scalar_lea.vmem [#allocation4], %s1330_s1  ;;  %s340_s1 = scalar_lea.vmem [#allocation4], %s659_s0 }
  0x2d   :  { %925 = vmatprep.subr.bf16.mxu1 %v924_v29  ;;  %896 = vmatprep.subr.bf16.mxu0 %v1025_v4  ;;  %v941_v12 = vpack.c.bf16 %v440_v10, %v439_v9  ;;  %v427_v22 = vld [vmem:[%s1366_s8 + $0x20] sm:$0xff]  ;;  %v974_v33 = vpack.c.bf16 %v430_v31, %v429_v30  ;;  %v448_v42 = vld [vmem:[%s1367_s9 + $0x48] sm:$0xff]  ;;  %v433_v44 = vld [vmem:[%s1366_s8 + $0x50] sm:$0xff]  ;;  %s350_s3 = scalar_lea.vmem [#allocation4], %s661_s6 }
  0x2e   :  { %v971_v25 = vpack.c.bf16 %v428_v23, %v427_v22  ;;  %v443_v26 = vld [vmem:[%s1367_s9 + $0x20] sm:$0xff]  ;;  %v434_v45 = vld [vmem:[%s1366_s8 + $0x58] sm:$0xff]  ;;  %v436_v54 = vld [vmem:[%s1366_s8 + $0x68] sm:$0xff] }
  0x2f   :  { %s276_s12 = scalar_lea.vmem [#allocation2], %s646_s7  ;;  %v947_v28 = vpack.c.bf16 %v444_v27, %v443_v26  ;;  %v431_v38 = vld [vmem:[%s1366_s8 + $0x40] sm:$0xff]  ;;  %v980_v49 = vpack.c.bf16 %v434_v45, %v433_v44 }
  0x30   :  { %927 = vmatpush3.bf16.msra.mxu1 %v924_v29  ;;  %898 = vmatpush3.bf16.msra.mxu0 %v897_v34  ;;  %v445_v34 = vld [vmem:[%s1367_s9 + $0x30] sm:$0xff]  ;;  %v435_v53 = vld [vmem:[%s1366_s8 + $0x60] sm:$0xff] }
  0x31   :  { %929 = vmatprep.subr.bf16.mxu1 %v928_v35  ;;  %899 = vmatprep.subr.bf16.mxu0 %v1025_v4 }
  0x34   :  { %931 = vmatpush3.bf16.msra.mxu1 %v928_v35  ;;  %901 = vmatpush3.bf16.msra.mxu0 %v900_v40  ;;  %v446_v35 = vld [vmem:[%s1367_s9 + $0x38] sm:$0xff]  ;;  %v977_v40 = vpack.c.bf16 %v432_v39, %v431_v38 }
  0x35   :  { %933 = vmatprep.subr.bf16.mxu1 %v932_v41  ;;  %902 = vmatprep.subr.bf16.mxu0 %v1025_v4  ;;  %v950_v37 = vpack.c.bf16 %v446_v35, %v445_v34 }
  0x38   :  { %935 = vmatpush3.bf16.msra.mxu1 %v932_v41  ;;  %904 = vmatpush3.bf16.msra.mxu0 %v903_v46  ;;  %v447_v41 = vld [vmem:[%s1367_s9 + $0x40] sm:$0xff]  ;;  %v449_v46 = vld [vmem:[%s1367_s9 + $0x50] sm:$0xff] }
  0x39   :  { %937 = vmatprep.subr.bf16.mxu1 %v936_v47  ;;  %905 = vmatprep.subr.bf16.mxu0 %v1025_v4  ;;  %v953_v43 = vpack.c.bf16 %v448_v42, %v447_v41 }
  0x3c   :  { %939 = vmatpush3.bf16.msra.mxu1 %v936_v47  ;;  %907 = vmatpush3.bf16.msra.mxu0 %v906_v50  ;;  %v450_v50 = vld [vmem:[%s1367_s9 + $0x58] sm:$0xff] }
  0x3d   :  { %964 = vmatprep.subr.bf16.mxu1 %v1025_v4  ;;  %940 = vmatprep.subr.bf16.mxu0 %v1025_v4 }
  0x3f   :  { %812 = vmatmul.mubr.f32.vlgmr.msra.gmra.mrb[0].mxu1 %v152_v51  ;;  %777 = vmatmul.mubr.f32.vlgmr.msra.gmra.mrb[0].mxu0 %v1211_v52  ;;  %v956_v51 = vpack.c.bf16 %v450_v50, %v449_v46 }
  0x40   :  { %881 = vmatprep.mubr.msk.f32.mxu1 %vm1026_vm0, %v1027_v8  ;;  %846 = vmatprep.mubr.msk.f32.mxu0 %vm1026_vm0, %v1027_v8  ;;  %v965_v8 = vpack.c.bf16 %v424_v7, %v423_v6 }
  0x41   :  { %942 = vmatpush3.bf16.msra.mxu0 %v941_v12 }
  0x42   :  { %966 = vmatpush3.bf16.msra.mxu1 %v965_v8  ;;  %943 = vmatprep.subr.bf16.mxu0 %v1025_v4 }
  0x43   :  { %967 = vmatprep.subr.bf16.mxu1 %v1025_v4 }
  0x45   :  { %945 = vmatpush3.bf16.msra.mxu0 %v944_v20 }
  0x46   :  { %969 = vmatpush3.bf16.msra.mxu1 %v968_v17  ;;  %946 = vmatprep.subr.bf16.mxu0 %v1025_v4 }
  0x47   :  { %970 = vmatprep.subr.bf16.mxu1 %v1025_v4 }
  0x49   :  { %948 = vmatpush3.bf16.msra.mxu0 %v947_v28 }
  0x4a   :  { %972 = vmatpush3.bf16.msra.mxu1 %v971_v25  ;;  %949 = vmatprep.subr.bf16.mxu0 %v1025_v4 }
  0x4b   :  { %973 = vmatprep.subr.bf16.mxu1 %v1025_v4 }
  0x4d   :  { %951 = vmatpush3.bf16.msra.mxu0 %v950_v37 }
  0x4e   :  { %975 = vmatpush3.bf16.msra.mxu1 %v974_v33  ;;  %952 = vmatprep.subr.bf16.mxu0 %v1025_v4 }
  0x4f   :  { %976 = vmatprep.subr.bf16.mxu1 %v1025_v4 }
  0x51   :  { %954 = vmatpush3.bf16.msra.mxu0 %v953_v43 }
  0x52   :  { %978 = vmatpush3.bf16.msra.mxu1 %v977_v40  ;;  %955 = vmatprep.subr.bf16.mxu0 %v1025_v4 }
  0x53   :  { %979 = vmatprep.subr.bf16.mxu1 %v1025_v4 }
  0x55   :  { %957 = vmatpush3.bf16.msra.mxu0 %v956_v51 }
  0x56   :  { %981 = vmatpush3.bf16.msra.mxu1 %v980_v49  ;;  %958 = vmatprep.subr.bf16.mxu0 %v1025_v4 }
  0x57   :  { %982 = vmatprep.subr.bf16.mxu1 %v1025_v4 }
 0x112   :  { %v813_v56 = vpop.f32.mrb[0].mxu1  ;;  %v146_v57 = vpop.f32.mrb[0].mxu0 }
 0x113   :  { %v248_v58 = vadd.f32 %v813_v56, %v643_v55  ;;  %v242_v59 = vpop.f32.mrb[1].mxu1  ;;  %150 = vst [vmem:[#allocation2] sm:$0xff] %v146_v57  ;;  %v778_v60 = vpop.f32.mrb[1].mxu0  ;;  %v452_v56 = vld [vmem:[%s1367_s9 + $0x68] sm:$0xff] }
 0x114   :  { %v243_v61 = vadd.f32 %v643_v55, %v242_v59  ;;  %v451_v55 = vld [vmem:[%s1367_s9 + $0x60] sm:$0xff]  ;;  %v983_v59 = vpack.c.bf16 %v436_v54, %v435_v53 }
 0x115   :  { %252 = vst [vmem:[#allocation3 + $0x8] sm:$0xff] %v248_v58 }
 0x116   :  { %251 = vst [vmem:[#allocation3] sm:$0xff] %v243_v61  ;;  %v959_v61 = vpack.c.bf16 %v452_v56, %v451_v55  ;;  %984 = vmatpush3.bf16.msra.mxu1 %v983_v59 }
 0x117   :  { %985 = vmatprep.subr.bf16.mxu1 %v1025_v4 }
 0x118   :  { %960 = vmatpush3.bf16.msra.mxu0 %v959_v61 }
 0x119   :  { %961 = vmatprep.subr.bf16.mxu0 %v1025_v4 }
 0x11a   :  { %v257_v62 = vld [vmem:[%s256_s16] sm:$0x1]  ;;  %s652_s16 = sld [smem:[#allocation5 + $0x5]] }
 0x11b   :  { %v267_v5 = vld [vmem:[%s266_s18] sm:$0x1]  ;;  %s655_s18 = sld [smem:[#allocation7 + $0x6]] }
 0x11c   :  { %v277_v21 = vld [vmem:[%s276_s12] sm:$0x1]  ;;  %v338_v23 = vld [vmem:[#allocation3 + $0x8] sm:$0x1]  ;;  %v348_v28 = vld [vmem:[#allocation3 + $0x9] sm:$0x1] }
 0x11d   :  { %v258_v63 = vld [vmem:[#allocation3] sm:$0x1]  ;;  %v268_v3 = vld [vmem:[#allocation3 + $0x1] sm:$0x1]  ;;  %v278_v24 = vld [vmem:[#allocation3 + $0x2] sm:$0x1] }
 0x11e   :  { %v259_v1 = vadd.f32 %v258_v63, %v257_v62  ;;  %v269_v11 = vadd.f32 %v268_v3, %v267_v5  ;;  %v279_v29 = vadd.f32 %v278_v24, %v277_v21  ;;  %v288_v47 = vld [vmem:[#allocation3 + $0x3] sm:$0x1]  ;;  %v287_v48 = vld [vmem:[%s286_s19] sm:$0x1]  ;;  %v437_v62 = vld [vmem:[%s1366_s8 + $0x70] sm:$0xff]  ;;  %s656_s19 = sld [smem:[#allocation5 + $0x7]] }
 0x11f   :  { %v289_v57 = vadd.f32 %v288_v47, %v287_v48  ;;  %v438_v63 = vld [vmem:[%s1366_s8 + $0x78] sm:$0xff]  ;;  %v298_v5 = vld [vmem:[#allocation3 + $0x4] sm:$0x1]  ;;  %s296_s8 = scalar_lea.vmem [#allocation2], %s1301_s14  ;;  %v308_v10 = vld [vmem:[#allocation3 + $0x5] sm:$0x1] }
 0x120   :  { %v262_v2 = vadd.f32 %v261_v0, %v259_v1  ;;  %v453_v0 = vld [vmem:[%s1367_s9 + $0x70] sm:$0xff]  ;;  %v454_v1 = vld [vmem:[%s1367_s9 + $0x78] sm:$0xff]  ;;  %v297_v6 = vld [vmem:[%s296_s8] sm:$0x1]  ;;  %s654_s9 = sld [smem:[#allocation5 + $0x6]]  ;;  %s306_s7 = scalar_lea.vmem [#allocation2], %s652_s16 }
 0x121   :  { %v962_v3 = vpack.c.bf16 %v454_v1, %v453_v0  ;;  %v299_v7 = vadd.f32 %v298_v5, %v297_v6  ;;  %v318_v4 = vld [vmem:[#allocation3 + $0x6] sm:$0x1]  ;;  %s320_s23 = scalar_lea.vmem [#allocation4], %s655_s18  ;;  %v328_v18 = vld [vmem:[#allocation3 + $0x7] sm:$0x1]  ;;  %s360_s12 = scalar_lea.vmem [#allocation4], %s663_s30  ;;  %v419_v0 = vpop.permute.xlu0 %418 }
 0x122   :  { %263 = vst [vmem:[%s260_s4] sm:$0x1] %v262_v2  ;;  %v986_v2 = vpack.c.bf16 %v438_v63, %v437_v62  ;;  %s653_s4 = sld [smem:[#allocation7 + $0x5]]  ;;  %v337_v24 = vld [vmem:[%s336_s27] sm:$0x1]  ;;  %v358_v33 = vld [vmem:[#allocation3 + $0xa] sm:$0x1] }
 0x123   :  { %963 = vmatpush3.bf16.msra.mxu0 %v962_v3  ;;  %v339_v25 = vadd.f32 %v338_v23, %v337_v24  ;;  %v368_v38 = vld [vmem:[#allocation3 + $0xb] sm:$0x1]  ;;  %s366_s16 = scalar_lea.vmem [#allocation2], %s664_s5  ;;  %s667_s8 = sld [smem:[#allocation7 + $0xc]]  ;;  %v378_v43 = vld [vmem:[#allocation3 + $0xc] sm:$0x1] }
 0x124   :  { %987 = vmatpush3.bf16.msra.mxu1 %v986_v2  ;;  %v367_v39 = vld [vmem:[%s366_s16] sm:$0x1]  ;;  %v388_v48 = vld [vmem:[#allocation3 + $0xd] sm:$0x1]  ;;  %v398_v54 = vld [vmem:[#allocation3 + $0xe] sm:$0x1] }
 0x125   :  { %v369_v40 = vadd.f32 %v368_v38, %v367_v39  ;;  %v408_v59 = vld [vmem:[#allocation3 + $0xf] sm:$0x1] }
 0x126   :  { %s316_s21 = scalar_lea.vmem [#allocation2], %s654_s9  ;;  %s376_s9 = scalar_lea.vmem [#allocation2], %s666_s15 }
 0x127   :  { %882 = vmatmul.mubr.f32.vlgmr.msra.gmra.mrb[2].mxu1 %v1211_v52  ;;  %v317_v15 = vld [vmem:[%s316_s21] sm:$0x1]  ;;  %s671_s21 = sld [smem:[#allocation7 + $0xe]] }
 0x128   :  { %s310_s14 = scalar_lea.vmem [#allocation4], %s653_s4  ;;  %v319_v16 = vadd.f32 %v318_v4, %v317_v15  ;;  %s370_s4 = scalar_lea.vmem [#allocation4], %s665_s2  ;;  %v377_v44 = vld [vmem:[%s376_s9] sm:$0x1] }
 0x129   :  { %v271_v13 = vld [vmem:[%s270_s26] sm:$0x1]  ;;  %v379_v45 = vadd.f32 %v378_v43, %v377_v44  ;;  %s380_s18 = scalar_lea.vmem [#allocation4], %s667_s8 }
 0x12a   :  { %v272_v14 = vadd.f32 %v271_v13, %v269_v11  ;;  %v307_v11 = vld [vmem:[%s306_s7] sm:$0x1]  ;;  %s669_s7 = sld [smem:[#allocation7 + $0xd]] }
 0x12b   :  { %v309_v12 = vadd.f32 %v308_v10, %v307_v11 }
 0x12c   :  { %273 = vst [vmem:[%s270_s26] sm:$0x1] %v272_v14  ;;  %s660_s26 = sld [smem:[#allocation5 + $0x9]] }
 0x12d   :  { %s400_s0 = scalar_lea.vmem [#allocation4], %s671_s21 }
 0x130   :  { %s390_s22 = scalar_lea.vmem [#allocation4], %s669_s7 }
 0x132   :  { %s346_s29 = scalar_lea.vmem [#allocation2], %s660_s26 }
 0x133   :  { %v281_v32 = vld [vmem:[%s280_s25] sm:$0x1] }
 0x134   :  { %v282_v36 = vadd.f32 %v281_v32, %v279_v29  ;;  %v347_v29 = vld [vmem:[%s346_s29] sm:$0x1] }
 0x135   :  { %v349_v30 = vadd.f32 %v348_v28, %v347_v29 }
 0x136   :  { %283 = vst [vmem:[%s280_s25] sm:$0x1] %v282_v36  ;;  %s326_s25 = scalar_lea.vmem [#allocation2], %s656_s19 }
 0x137   :  { %v327_v19 = vld [vmem:[%s326_s25] sm:$0x1]  ;;  %s673_s25 = sld [smem:[#allocation7 + $0xf]] }
 0x138   :  { %v329_v20 = vadd.f32 %v328_v18, %v327_v19 }
 0x13d   :  { %v291_v58 = vld [vmem:[%s290_s28] sm:$0x1]  ;;  %s410_s26 = scalar_lea.vmem [#allocation4], %s673_s25 }
 0x13e   :  { %v292_v60 = vadd.f32 %v291_v58, %v289_v57 }
 0x140   :  { %293 = vst [vmem:[%s290_s28] sm:$0x1] %v292_v60  ;;  %s662_s28 = sld [smem:[#allocation5 + $0xa]] }
 0x146   :  { %s356_s20 = scalar_lea.vmem [#allocation2], %s662_s28 }
 0x147   :  { %v301_v8 = vld [vmem:[%s300_s17] sm:$0x1] }
 0x148   :  { %v302_v9 = vadd.f32 %v301_v8, %v299_v7  ;;  %v357_v34 = vld [vmem:[%s356_s20] sm:$0x1] }
 0x149   :  { %v359_v35 = vadd.f32 %v358_v33, %v357_v34  ;;  %v674_v7 = vld [vmem:[%s1368_s10] ss:$0 sm:$0xff] }
 0x14a   :  { %303 = vst [vmem:[%s300_s17] sm:$0x1] %v302_v9  ;;  %s668_s17 = sld [smem:[#allocation5 + $0xd]] }
 0x150   :  { %s386_s19 = scalar_lea.vmem [#allocation2], %s668_s17 }
 0x151   :  { %v311_v13 = vld [vmem:[%s310_s14] sm:$0x1] }
 0x152   :  { %v312_v14 = vadd.f32 %v311_v13, %v309_v12  ;;  %v387_v49 = vld [vmem:[%s386_s19] sm:$0x1] }
 0x153   :  { %v389_v50 = vadd.f32 %v388_v48, %v387_v49 }
 0x154   :  { %313 = vst [vmem:[%s310_s14] sm:$0x1] %v312_v14  ;;  %s670_s14 = sld [smem:[#allocation5 + $0xe]] }
 0x15a   :  { %s396_s24 = scalar_lea.vmem [#allocation2], %s670_s14 }
 0x15b   :  { %v321_v17 = vld [vmem:[%s320_s23] sm:$0x1] }
 0x15c   :  { %v322_v52 = vadd.f32 %v321_v17, %v319_v16  ;;  %v397_v55 = vld [vmem:[%s396_s24] sm:$0x1] }
 0x15d   :  { %v399_v56 = vadd.f32 %v398_v54, %v397_v55 }
 0x15e   :  { %323 = vst [vmem:[%s320_s23] sm:$0x1] %v322_v52  ;;  %s672_s23 = sld [smem:[#allocation5 + $0xf]] }
 0x165   :  { %v331_v21 = vld [vmem:[%s330_s13] sm:$0x1] }
 0x166   :  { %v332_v22 = vadd.f32 %v331_v21, %v329_v20 }
 0x168   :  { %333 = vst [vmem:[%s330_s13] sm:$0x1] %v332_v22  ;;  %s406_s13 = scalar_lea.vmem [#allocation2], %s672_s23 }
 0x169   :  { %v407_v60 = vld [vmem:[%s406_s13] sm:$0x1] }
 0x16a   :  { %v409_v61 = vadd.f32 %v408_v59, %v407_v60 }
 0x16f   :  { %v341_v26 = vld [vmem:[%s340_s1] sm:$0x1] }
 0x170   :  { %v342_v27 = vadd.f32 %v341_v26, %v339_v25 }
 0x172   :  { %343 = vst [vmem:[%s340_s1] sm:$0x1] %v342_v27 }
 0x179   :  { %v351_v31 = vld [vmem:[%s350_s3] sm:$0x1] }
 0x17a   :  { %v352_v32 = vadd.f32 %v351_v31, %v349_v30 }
 0x17c   :  { %353 = vst [vmem:[%s350_s3] sm:$0x1] %v352_v32 }
 0x183   :  { %v361_v36 = vld [vmem:[%s360_s12] sm:$0x1] }
 0x184   :  { %v362_v37 = vadd.f32 %v361_v36, %v359_v35 }
 0x186   :  { %363 = vst [vmem:[%s360_s12] sm:$0x1] %v362_v37 }
 0x18d   :  { %v371_v41 = vld [vmem:[%s370_s4] sm:$0x1] }
 0x18e   :  { %v372_v42 = vadd.f32 %v371_v41, %v369_v40 }
 0x190   :  { %373 = vst [vmem:[%s370_s4] sm:$0x1] %v372_v42 }
 0x197   :  { %v381_v46 = vld [vmem:[%s380_s18] sm:$0x1] }
 0x198   :  { %v382_v47 = vadd.f32 %v381_v46, %v379_v45 }
 0x19a   :  { %383 = vst [vmem:[%s380_s18] sm:$0x1] %v382_v47 }
 0x1a1   :  { %v391_v51 = vld [vmem:[%s390_s22] sm:$0x1] }
 0x1a2   :  { %v392_v53 = vadd.f32 %v391_v51, %v389_v50 }
 0x1a4   :  { %393 = vst [vmem:[%s390_s22] sm:$0x1] %v392_v53 }
 0x1ab   :  { %v401_v57 = vld [vmem:[%s400_s0] sm:$0x1] }
 0x1ac   :  { %v402_v58 = vadd.f32 %v401_v57, %v399_v56 }
 0x1ae   :  { %403 = vst [vmem:[%s400_s0] sm:$0x1] %v402_v58 }
 0x1b5   :  { %v411_v62 = vld [vmem:[%s410_s26] sm:$0x1] }
 0x1b6   :  { %v412_v63 = vadd.f32 %v411_v62, %v409_v61 }
 0x1b8   :  { %413 = vst [vmem:[%s410_s26] sm:$0x1] %v412_v63 }
 0x1bf   :  { %v414_v1 = vld [vmem:[#allocation4] sm:$0xff] }
 0x1c0   :  { %v421_v2 = vmul.f32 %v419_v0, %v414_v1 }
 0x1c2   :  { %847 = vmatmul.mubr.f32.vlgmr.msra.gmra.mrb[2].mxu0 %v421_v2 }
 0x1fa   :  { %v591_v3 = vpop.f32.mrb[2].mxu1 }
 0x1fb   :  { %v883_v5 = vpop.f32.mrb[3].mxu1 }
 0x295   :  { %v521_v6 = vpop.f32.mrb[2].mxu0 }
 0x296   :  { %v592_v8 = vadd.f32 %v591_v3, %v521_v6  ;;  %v848_v9 = vpop.f32.mrb[3].mxu0 }
 0x298   :  { %v602_v10 = vadd.f32 %v674_v7, %v592_v8 }
 0x29a   :  { %v603_v11 = vmax.f32 %v602_v10, 0.0 }
 0x29c   :  { %604 = vst [vmem:[%s1369_s11] sm:$0xff] %v603_v11 }
 0x29d   :  { %609 = vsyncpa [#allocation6], 1 }
 0x29e   :  { %610 = vsyncpa [#allocation8], 1 }

</bundles_post_ra>
